<compile_context>
chip_gen: v7x
topology: tpu7x:2x2x1
jax: 0.10.0
libtpu: 0.0.40
codegen_flags: <defaults>
</compile_context>

<pallas_src>
import functools

import jax
import jax.numpy as jnp
from jax import lax
from jax.experimental import pallas as pl
from jax.experimental.pallas import tpu as pltpu


def _round_up(n, m):
    return ((n + m - 1) // m) * m


def _critic_kernel(xu_ref, w1_ref, b1_ref, w2_ref, b2_ref, w3_ref, o_ref):
    mxu_dtype = w1_ref.dtype  # weights are pre-cast; activations cast to match

    # Layer 1: (tile, K) @ (K, H1) on the MXU, f32 accumulation.
    xu = xu_ref[...].astype(mxu_dtype)
    h1 = jnp.dot(xu, w1_ref[...], preferred_element_type=jnp.float32) + b1_ref[...]
    h1 = jnp.maximum(h1, 0.0)

    # Layer 2: (tile, H1) @ (H1, H2) on the MXU, f32 accumulation.
    h2 = (jnp.dot(h1.astype(w2_ref.dtype), w2_ref[...],
                  preferred_element_type=jnp.float32)
          + b2_ref[...])
    h2 = jnp.maximum(h2, 0.0)

    # Layer 3 (N=1): contract (1, H2) against (tile, H2) along H2 to produce a
    # lane-dense (1, tile) row directly (no (tile, 1) masked column stores).
    # Padded columns of h2/w3 are zero, so they contribute nothing.
    h3 = lax.dot_general(w3_ref[...], h2, (((1,), (1,)), ((), ())),
                         preferred_element_type=jnp.float32)      # (1, tile)
    o_ref[...] = h3.astype(o_ref.dtype)


def prepare_params(params, *, mxu_dtype=jnp.bfloat16, lane=128):
    """Pad hidden dims to lane multiples and pre-cast MXU operands.

    Returns (w1, b1, w2, b2, w3_row, b3) with:
      w1: (K, H1) mxu_dtype     b1: (1, H1) f32
      w2: (H1, H2) mxu_dtype    b2: (1, H2) f32
      w3_row: (1, H2) f32       b3: (1, 1) f32
    where K = state_dim + action_dim, H1 = round_up(400,128) = 512,
    H2 = round_up(300,128) = 384. Zero-padded rows/cols are inert through
    ReLU and the following matmul.
    """
    w1, b1, w2, b2, w3, b3 = params
    h1 = w1.shape[1]
    h2 = w2.shape[1]
    H1 = _round_up(h1, lane)
    H2 = _round_up(h2, lane)

    w1p = jnp.pad(w1, ((0, 0), (0, H1 - h1))).astype(mxu_dtype)
    b1p = jnp.pad(b1, ((0, 0), (0, H1 - h1))).astype(jnp.float32)

    w2p = jnp.pad(w2, ((0, H1 - h1), (0, H2 - h2))).astype(mxu_dtype)
    b2p = jnp.pad(b2, ((0, 0), (0, H2 - h2))).astype(jnp.float32)

    w3_row = jnp.pad(w3.T, ((0, 0), (0, H2 - h2))).astype(jnp.float32)  # (1, H2)
    b3p = b3.astype(jnp.float32)
    return (w1p, b1p, w2p, b2p, w3_row, b3p)


@functools.partial(jax.jit, static_argnames=("batch_tile",))
def critic_forward(x, u, prepared_params, *, batch_tile=512):
    """JAX/Pallas equivalent of Critic.forward.

    x: (B, state_dim) f32, u: (B, action_dim) f32 -> (B, 1) f32.
    `batch_tile` (sweep 256/512/1024 for large B) bounds the per-step batch
    tile; the tile is additionally capped so the grid has >= 2 steps whenever
    B spans more than one 128-row tile (keeps both v7x TensorCores busy).
    """
    w1, b1, w2, b2, w3_row, b3 = prepared_params
    B = x.shape[0]
    K = w1.shape[0]                  # state_dim + action_dim
    H1 = w1.shape[1]
    H2 = w2.shape[1]

    # Single concatenated activation stream (one DMA, one K-dim matmul).
    xu = jnp.concatenate([x, u], axis=1)       # (B, K)

    # MXU-row-aligned batch tile.
    Bp0 = _round_up(max(B, 1), 128)
    half = max(128, _round_up(Bp0 // 2, 128))  # ensure >=2 grid steps if possible
    tile = min(batch_tile, half)
    Bp = _round_up(max(B, 1), tile)
    if Bp != B:
        xu = jnp.pad(xu, ((0, Bp - B), (0, 0)))

    grid = (Bp // tile,)

    out = pl.pallas_call(
        _critic_kernel,
        out_shape=jax.ShapeDtypeStruct((1, Bp), jnp.float32),
        grid_spec=pltpu.PrefetchScalarGridSpec(
            num_scalar_prefetch=0,
            grid=grid,
            in_specs=[
                # activations: tiled over batch
                pl.BlockSpec((tile, K), lambda i: (i, 0)),
                # weights / biases: constant index maps -> fetched once, resident
                pl.BlockSpec((K, H1), lambda i: (0, 0)),
                pl.BlockSpec((1, H1), lambda i: (0, 0)),
                pl.BlockSpec((H1, H2), lambda i: (0, 0)),
                pl.BlockSpec((1, H2), lambda i: (0, 0)),
                pl.BlockSpec((1, H2), lambda i: (0, 0)),
            ],
            # lane-dense output row: (1, tile) unmasked stores per step
            out_specs=pl.BlockSpec((1, tile), lambda i: (0, i)),
        ),
        compiler_params=pltpu.CompilerParams(
            dimension_semantics=("parallel",),   # shards batch tiles across TCs (v7x)
            vmem_limit_bytes=32 * 1024 * 1024,
        ),
    )(xu, w1, b1, w2, b2, w3_row)

    # Back to (B, 1); scalar layer-3 bias added here instead of in-kernel.
    return out[0, :B][:, None] + b3


def init_critic_params(key, state_dim, action_dim):
    """Deterministic init matching the module's layer shapes.

    PyTorch nn.Linear default: U(-1/sqrt(fan_in), 1/sqrt(fan_in)) for W and b.
    Weights are stored as (in, out) — transposed vs. torch's (out, in).
    """
    dims = [(state_dim + action_dim, 400), (400, 300), (300, 1)]
    params = []
    for (fan_in, fan_out) in dims:
        key, kw, kb = jax.random.split(key, 3)
        bound = 1.0 / jnp.sqrt(float(fan_in))
        w = jax.random.uniform(kw, (fan_in, fan_out), jnp.float32, -bound, bound)
        b = jax.random.uniform(kb, (1, fan_out), jnp.float32, -bound, bound)
        params.extend([w, b])
    return tuple(params)


def critic_reference(x, u, params):
    """Pure-JAX reference for validation."""
    w1, b1, w2, b2, w3, b3 = params
    h = jnp.concatenate([x, u], axis=1)
    h = jnp.maximum(h @ w1 + b1, 0.0)
    h = jnp.maximum(h @ w2 + b2, 0.0)
    return h @ w3 + b3


if __name__ == "__main__":
    key = jax.random.PRNGKey(0)
    k_param, k_x, k_u = jax.random.split(key, 3)

    batch, state_dim, action_dim = 2, 8, 4
    params = init_critic_params(k_param, state_dim, action_dim)

    x = jax.random.normal(k_x, (batch, state_dim), jnp.float32)
    u = jax.random.normal(k_u, (batch, action_dim), jnp.float32)

    ref = critic_reference(x, u, params)

    # Default path: bf16 MXU operands, f32 accumulation + f32 elementwise.
    prepared_bf16 = prepare_params(params)                       # bf16 weights
    out = jax.block_until_ready(critic_forward(x, u, prepared_bf16))
    assert out.shape == (batch, 1), out.shape
    assert jnp.allclose(out, ref, atol=5e-2, rtol=5e-2), (out, ref)

    # Full-f32 MXU path (tight tolerance).
    prepared_f32 = prepare_params(params, mxu_dtype=jnp.float32)
    out_f32 = jax.block_until_ready(critic_forward(x, u, prepared_f32))
    assert out_f32.shape == (batch, 1), out_f32.shape
    assert jnp.allclose(out_f32, ref, atol=1e-4, rtol=1e-4), (out_f32, ref)

    print("KERNEL_OK")
</pallas_src>

<mosaic_0001>
module attributes {stable_mosaic.version = 11 : i64} {
  func.func @_critic_kernel(%arg0: i32, %arg1: memref<128x12xf32, #tpu.memory_space<vmem>>, %arg2: memref<12x512xbf16, #tpu.memory_space<vmem>>, %arg3: memref<1x512xf32, #tpu.memory_space<vmem>>, %arg4: memref<512x384xbf16, #tpu.memory_space<vmem>>, %arg5: memref<1x384xf32, #tpu.memory_space<vmem>>, %arg6: memref<1x384xf32, #tpu.memory_space<vmem>>, %arg7: memref<1x128xf32, #tpu.memory_space<vmem>>) attributes {dimension_semantics = [#tpu.dimension_semantics<parallel>], iteration_bounds = array<i64: 1>, scalar_prefetch = 0 : i64, scratch_operands = 0 : i64, tpu.core_type = #tpu.core_type<tc>, window_params = [{transform_indices = @transform_0, window_bounds = array<i64: 128, 12>}, {pipeline_mode = #tpu.pipeline_mode<synchronous>, transform_indices = @transform_1, window_bounds = array<i64: 12, 512>}, {pipeline_mode = #tpu.pipeline_mode<synchronous>, transform_indices = @transform_2, window_bounds = array<i64: 1, 512>}, {pipeline_mode = #tpu.pipeline_mode<synchronous>, transform_indices = @transform_3, window_bounds = array<i64: 512, 384>}, {pipeline_mode = #tpu.pipeline_mode<synchronous>, transform_indices = @transform_4, window_bounds = array<i64: 1, 384>}, {pipeline_mode = #tpu.pipeline_mode<synchronous>, transform_indices = @transform_5, window_bounds = array<i64: 1, 384>}, {transform_indices = @transform_6, window_bounds = array<i64: 1, 128>}]} {
    %c0 = arith.constant 0 : index
    %c0_0 = arith.constant 0 : index
    %0 = vector.load %arg1[%c0, %c0_0] : memref<128x12xf32, #tpu.memory_space<vmem>>, vector<128x12xf32>
    %1 = arith.truncf %0 : vector<128x12xf32> to vector<128x12xbf16>
    %c0_1 = arith.constant 0 : index
    %c0_2 = arith.constant 0 : index
    %2 = vector.load %arg2[%c0_1, %c0_2] : memref<12x512xbf16, #tpu.memory_space<vmem>>, vector<12x512xbf16>
    %cst = arith.constant dense<0.000000e+00> : vector<128x512xf32>
    %3 = tpu.matmul %1, %2, %cst {dimension_numbers = #tpu.dot_dimension_numbers<[1], [0], [0], [1], [0, 0, 1, 1], [], []>} : vector<128x12xbf16>, vector<12x512xbf16>, vector<128x512xf32> -> vector<128x512xf32>
    %c0_3 = arith.constant 0 : index
    %c0_4 = arith.constant 0 : index
    %4 = vector.load %arg3[%c0_3, %c0_4] : memref<1x512xf32, #tpu.memory_space<vmem>>, vector<1x512xf32>
    %5 = vector.broadcast %4 : vector<1x512xf32> to vector<128x512xf32>
    %6 = arith.addf %3, %5 : vector<128x512xf32>
    %cst_5 = arith.constant 0.000000e+00 : f32
    %7 = vector.broadcast %cst_5 : f32 to vector<128x512xf32>
    %8 = arith.maximumf %6, %7 : vector<128x512xf32>
    %9 = arith.truncf %8 : vector<128x512xf32> to vector<128x512xbf16>
    %c0_6 = arith.constant 0 : index
    %c0_7 = arith.constant 0 : index
    %10 = vector.load %arg4[%c0_6, %c0_7] : memref<512x384xbf16, #tpu.memory_space<vmem>>, vector<512x384xbf16>
    %cst_8 = arith.constant dense<0.000000e+00> : vector<128x384xf32>
    %11 = tpu.matmul %9, %10, %cst_8 {dimension_numbers = #tpu.dot_dimension_numbers<[1], [0], [0], [1], [0, 0, 1, 1], [], []>} : vector<128x512xbf16>, vector<512x384xbf16>, vector<128x384xf32> -> vector<128x384xf32>
    %c0_9 = arith.constant 0 : index
    %c0_10 = arith.constant 0 : index
    %12 = vector.load %arg5[%c0_9, %c0_10] : memref<1x384xf32, #tpu.memory_space<vmem>>, vector<1x384xf32>
    %13 = vector.broadcast %12 : vector<1x384xf32> to vector<128x384xf32>
    %14 = arith.addf %11, %13 : vector<128x384xf32>
    %cst_11 = arith.constant 0.000000e+00 : f32
    %15 = vector.broadcast %cst_11 : f32 to vector<128x384xf32>
    %16 = arith.maximumf %14, %15 : vector<128x384xf32>
    %c0_12 = arith.constant 0 : index
    %c0_13 = arith.constant 0 : index
    %17 = vector.load %arg6[%c0_12, %c0_13] : memref<1x384xf32, #tpu.memory_space<vmem>>, vector<1x384xf32>
    %cst_14 = arith.constant dense<0.000000e+00> : vector<1x128xf32>
    %18 = tpu.matmul %17, %16, %cst_14 {dimension_numbers = #tpu.dot_dimension_numbers<[1], [1], [0], [0], [0, 0, 1, 0], [], []>} : vector<1x384xf32>, vector<128x384xf32>, vector<1x128xf32> -> vector<1x128xf32>
    %c0_15 = arith.constant 0 : index
    %c0_16 = arith.constant 0 : index
    %19 = vector.load %arg7[%c0_15, %c0_16] : memref<1x128xf32, #tpu.memory_space<vmem>>, vector<1x128xf32>
    tpu.vector_store %arg7[%c0_15, %c0_16], %18 {strides = array<i32>} : memref<1x128xf32, #tpu.memory_space<vmem>>, vector<1x128xf32>,
    return
  }
  func.func @transform_0(%arg0: i32) -> (i32, i32) {
    %c0_i32 = arith.constant 0 : i32
    %c0_i32_0 = arith.constant 0 : i32
    return %arg0, %c0_i32 : i32, i32
  }
  func.func @transform_1(%arg0: i32) -> (i32, i32) {
    %c0_i32 = arith.constant 0 : i32
    %c0_i32_0 = arith.constant 0 : i32
    %c0_i32_1 = arith.constant 0 : i32
    return %c0_i32, %c0_i32_0 : i32, i32
  }
  func.func @transform_2(%arg0: i32) -> (i32, i32) {
    %c0_i32 = arith.constant 0 : i32
    %c0_i32_0 = arith.constant 0 : i32
    %c0_i32_1 = arith.constant 0 : i32
    return %c0_i32, %c0_i32_0 : i32, i32
  }
  func.func @transform_3(%arg0: i32) -> (i32, i32) {
    %c0_i32 = arith.constant 0 : i32
    %c0_i32_0 = arith.constant 0 : i32
    %c0_i32_1 = arith.constant 0 : i32
    return %c0_i32, %c0_i32_0 : i32, i32
  }
  func.func @transform_4(%arg0: i32) -> (i32, i32) {
    %c0_i32 = arith.constant 0 : i32
    %c0_i32_0 = arith.constant 0 : i32
    %c0_i32_1 = arith.constant 0 : i32
    return %c0_i32, %c0_i32_0 : i32, i32
  }
  func.func @transform_5(%arg0: i32) -> (i32, i32) {
    %c0_i32 = arith.constant 0 : i32
    %c0_i32_0 = arith.constant 0 : i32
    %c0_i32_1 = arith.constant 0 : i32
    return %c0_i32, %c0_i32_0 : i32, i32
  }
  func.func @transform_6(%arg0: i32) -> (i32, i32) {
    %c0_i32 = arith.constant 0 : i32
    %c0_i32_0 = arith.constant 0 : i32
    return %c0_i32, %arg0 : i32, i32
  }
}

</mosaic_0001>

<bundles_post_ra>
// kernel: critic_forward.1
= control target key start
LH: loop header
LB: loop body
LE: loop exit
PB: predicated region body
PF: predicated region fallthrough
CT: control target
= control target key end

     0   :  { %11 = vsyncpa [#allocation3], 0  ;;  %s2336_s21 = smov [#allocation2]   ;;  %s2745_s0 = inlined_call_operand.vmem [shape: f32[128,12], index: 0, kind: input, shape index: {}]   ;;  %s2746_s1 = inlined_call_operand.vmem [shape: bf16[12,512], index: 1, kind: input, shape index: {}]   ;;  %s2747_s2 = inlined_call_operand.vmem [shape: f32[1,512], index: 2, kind: input, shape index: {}]   ;;  %s2748_s3 = inlined_call_operand.hbm [shape: bf16[512,384], index: 3, kind: input, shape index: {}]   ;;  %s2749_s4 = inlined_call_operand.vmem [shape: f32[1,384], index: 4, kind: input, shape index: {}]   ;;  %s2750_s5 = inlined_call_operand.vmem [shape: f32[1,384], index: 5, kind: input, shape index: {}]   ;;  %s2751_s6 = inlined_call_operand.vmem [shape: f32[1,128], index: 6, kind: output, shape index: {}]  }
   0x1   :  { %s23_s22 = sshll.u32 %s2336_s21, 4  ;;  %s2312_s25 = scalar_lea.hbm %s2748_s3, 12288  ;;  %s24_s22 = int_to_ptr.vmem [resolvable:$true] %s23_s22 }
   0x2   :  { %p2313_p0 = scmp.ne.s32.totalorder %s2748_s3, %s2312_s25  ;;  %p2316_p1 = scmp.lt.u32.totalorder %s2312_s25, %s2748_s3 }
   0x4   :  { %p2318_p2 = pnand %p2316_p1, %p2313_p0 }
   0x6   :  { %2321 = shalt.err (!%p2318_p2)
}
   0x7   :  { %s2322_s30 = scalar_lea.vmem %s24_s22, 12288  ;;  %p2327_p4 = scmp.lt.s32.totalorder %s24_s22, %s24_s22 }
   0x8   :  { %p2323_p3 = scmp.ne.s32.totalorder %s24_s22, %s2322_s30  ;;  %p2328_p5 = scmp.lt.s32.totalorder %s2322_s30, %s2322_s30 }
   0xa   :  { %p2329_p6 = por %p2328_p5, %p2327_p4 }
   0xc   :  { %p2330_p7 = pnand %p2329_p6, %p2323_p3 }
   0xe   :  { %2333 = shalt.err (!%p2330_p7)
}
   0xf   :  { %s2337_s7 = smov 192   ;;  %s2338_s8 = smov 12  }
  0x10   :  { %29 = dma.hbm_to_vmem [thread:$0]  %s2748_s3, 12288, %s24_s22, [#allocation3], %s2337_s7, %s2337_s7, %s2338_s8  }
  0x11   :  { %2334 = dma.done.wait [#allocation3], 12288  }
  0x12   :  { %2335 = vsyncadd [#allocation3], 4294955008  ;;  %v2339_v0 = vmov 0   ;;  %vm129_vm0 = vcmask 1045504   ;;  %v38_v3 = vld [vmem:[%s2745_s0] sm:$0xff]  ;;  %v39_v4 = vld [vmem:[%s2745_s0 + $0x8] sm:$0xff] }
  0x13   :  { %174 = vmatprep.mubr.bf16.mxu0 %v2339_v0  ;;  %287 = vmatprep.mubr.bf16.mxu1 %v2339_v0  ;;  %v2178_v1 = vld [vmem:[%s2746_s1 + $0x4] ss:$16 sps:$4 sm:$0x3f]   ;;  %v2180_v2 = vld [vmem:[%s2746_s1] ss:$16 sps:$4 sm:$0x3f]   ;;  %v54_v6 = vpack.c.bf16 %v39_v4, %v38_v3 }
  0x14   :  { %1756 = vmatprep.subr.msk.bf16.mxu0 %vm129_vm0, %v2178_v1  ;;  %v131_v5 = vsel %vm129_vm0, %v2180_v2, 0  ;;  %vm104_vm1 = vcmask 97280   ;;  %v40_v7 = vld [vmem:[%s2745_s0 + $0x10] sm:$0xff]  ;;  %v41_v8 = vld [vmem:[%s2745_s0 + $0x18] sm:$0xff]  ;;  %v2184_v11 = vld [vmem:[#allocation2] ss:$12 sps:$4 sm:$0xff]  }
  0x15   :  { %143 = vmatpush1.bf16.msra.mxu0 %v131_v5  ;;  %v2181_v9 = vld [vmem:[%s2746_s1 + $0xc] ss:$16 sps:$4 sm:$0x3f]   ;;  %v2183_v10 = vld [vmem:[%s2746_s1 + $0x8] ss:$16 sps:$4 sm:$0x3f]   ;;  %v55_v15 = vpack.c.bf16 %v41_v8, %v40_v7 }
  0x16   :  { %1765 = vmatprep.subr.msk.bf16.mxu1 %vm129_vm0, %v2181_v9  ;;  %v2186_v12 = vld [vmem:[#allocation2 + $0x4] ss:$12 sps:$4 sm:$0xff]   ;;  %v137_v13 = vsel %vm129_vm0, %v2183_v10, 0  ;;  %v2187_v14 = vld [vmem:[#allocation2 + $0xc8] ss:$12 sps:$4 sm:$0xff]   ;;  %v45_v31 = vld [vmem:[%s2745_s0 + $0x38] sm:$0xff] }
  0x17   :  { %256 = vmatpush1.bf16.msra.mxu1 %v137_v13  ;;  %1121 = vmatprep.subr.bf16.mxu0 %v2186_v12  ;;  %v2188_v16 = vld [vmem:[#allocation2 + $0x8] ss:$12 sps:$4 sm:$0xff]   ;;  %v2189_v18 = vld [vmem:[#allocation2 + $0x18] ss:$12 sps:$4 sm:$0xff]   ;;  %v2195_v21 = vld [vmem:[#allocation2 + $0xe0] ss:$12 sps:$4 sm:$0xff]  }
  0x18   :  { %1757 = vmatmul.mubr.msk.bf16.vlgmr.msra.gmra.mrb[0].mxu0 %vm104_vm1, %v54_v6  ;;  %1870 = vmatprep.subr.bf16.mxu1 %v2187_v14  ;;  %v2191_v17 = vld [vmem:[#allocation2 + $0x1c] ss:$12 sps:$4 sm:$0xff]   ;;  %v2194_v19 = vld [vmem:[#allocation2 + $0x34] ss:$12 sps:$4 sm:$0xff]   ;;  %v2199_v25 = vld [vmem:[#allocation2 + $0x4c] ss:$12 sps:$4 sm:$0xff]  }
  0x19   :  { %184 = vmatprep.mubr.bf16.mxu0 %v2339_v0  ;;  %1122 = vmatpush1.bf16.msra.mxu0 %v2184_v11  ;;  %v42_v20 = vld [vmem:[%s2745_s0 + $0x20] sm:$0xff]  ;;  %v43_v22 = vld [vmem:[%s2745_s0 + $0x28] sm:$0xff]  ;;  %v2192_v24 = vld [vmem:[#allocation2 + $0x30] ss:$12 sps:$4 sm:$0xff]   ;;  %vm2341_vm2 = vmmov 0  }
  0x1a   :  { %1766 = vmatmul.mubr.msk.bf16.vlgmr.msra.gmra.mrb[0].mxu1 %vm104_vm1, %v54_v6  ;;  %1123 = vmatprep.subr.bf16.mxu0 %v2191_v17  ;;  %v2196_v23 = vld [vmem:[#allocation2 + $0x20] ss:$12 sps:$4 sm:$0xff]   ;;  %v56_v26 = vpack.c.bf16 %v43_v22, %v42_v20  ;;  %v2203_v27 = vld [vmem:[#allocation2 + $0xf8] ss:$12 sps:$4 sm:$0xff]   ;;  %v2197_v29 = vld [vmem:[#allocation2 + $0x48] ss:$12 sps:$4 sm:$0xff]  }
  0x1b   :  { %297 = vmatprep.mubr.bf16.mxu1 %v2339_v0  ;;  %1871 = vmatpush3.bf16.msra.mxu1 %v2188_v16  ;;  %v2204_v28 = vld [vmem:[#allocation2 + $0x38] ss:$12 sps:$4 sm:$0xff]   ;;  %v44_v30 = vld [vmem:[%s2745_s0 + $0x30] sm:$0xff]  ;;  %v2200_v33 = vld [vmem:[#allocation2 + $0x60] ss:$12 sps:$4 sm:$0xff]  }
  0x1c   :  { %1872 = vmatprep.subr.bf16.mxu1 %v2195_v21  ;;  %v2202_v32 = vld [vmem:[#allocation2 + $0x64] ss:$12 sps:$4 sm:$0xff]   ;;  %v2207_v36 = vld [vmem:[#allocation2 + $0x7c] ss:$12 sps:$4 sm:$0xff]   ;;  %v57_v37 = vpack.c.bf16 %v45_v31, %v44_v30  ;;  %v2210_v42 = vld [vmem:[#allocation2 + $0x94] ss:$12 sps:$4 sm:$0xff]  }
  0x1d   :  { %1124 = vmatpush1.bf16.msra.mxu0 %v2189_v18  ;;  %v2211_v34 = vld [vmem:[#allocation2 + $0x110] ss:$12 sps:$4 sm:$0xff]   ;;  %v2205_v38 = vld [vmem:[#allocation2 + $0x78] ss:$12 sps:$4 sm:$0xff]   ;;  %v2219_v39 = vld [vmem:[#allocation2 + $0x128] ss:$12 sps:$4 sm:$0xff]  }
  0x1e   :  { %1125 = vmatprep.subr.bf16.mxu0 %v2194_v19  ;;  %v2212_v35 = vld [vmem:[#allocation2 + $0x50] ss:$12 sps:$4 sm:$0xff]   ;;  %v2220_v40 = vld [vmem:[#allocation2 + $0x68] ss:$12 sps:$4 sm:$0xff]   ;;  %v46_v41 = vld [vmem:[%s2745_s0 + $0x40] sm:$0xff] }
  0x1f   :  { %1873 = vmatpush3.bf16.msra.mxu1 %v2196_v23  ;;  %v47_v43 = vld [vmem:[%s2745_s0 + $0x48] sm:$0xff]  ;;  %v2208_v44 = vld [vmem:[#allocation2 + $0x90] ss:$12 sps:$4 sm:$0xff]   ;;  %v2235_v52 = vld [vmem:[#allocation2 + $0x158] ss:$12 sps:$4 sm:$0xff]  }
  0x20   :  { %1758 = vmatmul.mubr.msk.bf16.gmra.mrb[4].mxu0 %vm104_vm1, %v55_v15  ;;  %1874 = vmatprep.subr.bf16.mxu1 %v2203_v27  ;;  %v2215_v45 = vld [vmem:[#allocation2 + $0xac] ss:$12 sps:$4 sm:$0xff]   ;;  %v58_v48 = vpack.c.bf16 %v47_v43, %v46_v41  ;;  %v2213_v49 = vld [vmem:[#allocation2 + $0xa8] ss:$12 sps:$4 sm:$0xff]   ;;  %v2218_v50 = vld [vmem:[#allocation2 + $0xc4] ss:$12 sps:$4 sm:$0xff]  }
  0x21   :  { %194 = vmatprep.mubr.bf16.mxu0 %v2339_v0  ;;  %1126 = vmatpush1.bf16.msra.mxu0 %v2192_v24  ;;  %v2227_v46 = vld [vmem:[#allocation2 + $0x140] ss:$12 sps:$4 sm:$0xff]   ;;  %v48_v51 = vld [vmem:[%s2745_s0 + $0x50] sm:$0xff]  ;;  %v2236_v53 = vld [vmem:[#allocation2 + $0x98] ss:$12 sps:$4 sm:$0xff]  }
  0x22   :  { %1767 = vmatmul.mubr.msk.bf16.gmra.mrb[4].mxu1 %vm104_vm1, %v55_v15  ;;  %1127 = vmatprep.subr.bf16.mxu0 %v2199_v25  ;;  %v2228_v47 = vld [vmem:[#allocation2 + $0x80] ss:$12 sps:$4 sm:$0xff]   ;;  %v49_v54 = vld [vmem:[%s2745_s0 + $0x58] sm:$0xff]  ;;  %v2229_v2 = vld [vmem:[#allocation2 + $0x108] ss:$12 sps:$4 sm:$0xff]  }
  0x23   :  { %307 = vmatprep.mubr.bf16.mxu1 %v2339_v0  ;;  %1875 = vmatpush3.bf16.msra.mxu1 %v2204_v28  ;;  %v2216_v55 = vld [vmem:[#allocation2 + $0xc0] ss:$12 sps:$4 sm:$0xff]   ;;  %v2223_v56 = vld [vmem:[#allocation2 + $0xdc] ss:$12 sps:$4 sm:$0xff]   ;;  %v59_v57 = vpack.c.bf16 %v49_v54, %v48_v51  ;;  %v2221_v58 = vld [vmem:[#allocation2 + $0xd8] ss:$12 sps:$4 sm:$0xff]  }
  0x24   :  { %1876 = vmatprep.subr.bf16.mxu1 %v2211_v34  ;;  %v2226_v59 = vld [vmem:[#allocation2 + $0xf4] ss:$12 sps:$4 sm:$0xff]   ;;  %v51_v61 = vld [vmem:[%s2745_s0 + $0x68] sm:$0xff]  ;;  %v2224_v62 = vld [vmem:[#allocation2 + $0xf0] ss:$12 sps:$4 sm:$0xff]  }
  0x25   :  { %1128 = vmatpush1.bf16.msra.mxu0 %v2197_v29  ;;  %v50_v60 = vld [vmem:[%s2745_s0 + $0x60] sm:$0xff]  ;;  %v2231_v63 = vld [vmem:[#allocation2 + $0x10c] ss:$12 sps:$4 sm:$0xff]   ;;  %v52_v4 = vld [vmem:[%s2745_s0 + $0x70] sm:$0xff] }
  0x26   :  { %1129 = vmatprep.subr.bf16.mxu0 %v2202_v32  ;;  %v60_v1 = vpack.c.bf16 %v51_v61, %v50_v60  ;;  %v2234_v3 = vld [vmem:[#allocation2 + $0x124] ss:$12 sps:$4 sm:$0xff]   ;;  %v53_v5 = vld [vmem:[%s2745_s0 + $0x78] sm:$0xff]  ;;  %v2232_v6 = vld [vmem:[#allocation2 + $0x120] ss:$12 sps:$4 sm:$0xff]  }
  0x27   :  { %1877 = vmatpush3.bf16.msra.mxu1 %v2212_v35  ;;  %v2239_v7 = vld [vmem:[#allocation2 + $0x13c] ss:$12 sps:$4 sm:$0xff]   ;;  %v61_v8 = vpack.c.bf16 %v53_v5, %v52_v4  ;;  %v2237_v9 = vld [vmem:[#allocation2 + $0x138] ss:$12 sps:$4 sm:$0xff]   ;;  %v2242_v10 = vld [vmem:[#allocation2 + $0x154] ss:$12 sps:$4 sm:$0xff]  }
  0x28   :  { %1759 = vmatmul.mubr.msk.bf16.gmra.mrb[8].mxu0 %vm104_vm1, %v56_v26  ;;  %1878 = vmatprep.subr.bf16.mxu1 %v2219_v39  ;;  %v2240_v11 = vld [vmem:[#allocation2 + $0x150] ss:$12 sps:$4 sm:$0xff]   ;;  %v2247_v13 = vld [vmem:[#allocation2 + $0x16c] ss:$12 sps:$4 sm:$0xff]   ;;  %v2245_v15 = vld [vmem:[#allocation2 + $0x168] ss:$12 sps:$4 sm:$0xff]  }
  0x29   :  { %204 = vmatprep.mubr.bf16.mxu0 %v2339_v0  ;;  %1130 = vmatpush1.bf16.msra.mxu0 %v2200_v33  ;;  %v2243_v12 = vld [vmem:[#allocation2 + $0x170] ss:$12 sps:$4 sm:$0xff]   ;;  %v2251_v17 = vld [vmem:[#allocation2 + $0x248] ss:$12 sps:$4 sm:$0xff]   ;;  %v66_v20 = vld [vmem:[%s2747_s2] sm:$0xf] }
  0x2a   :  { %1768 = vmatmul.mubr.msk.bf16.gmra.mrb[8].mxu1 %vm104_vm1, %v56_v26  ;;  %1131 = vmatprep.subr.bf16.mxu0 %v2207_v36  ;;  %v2244_v14 = vld [vmem:[#allocation2 + $0xb0] ss:$12 sps:$4 sm:$0xff]   ;;  %v2259_v51 = vld [vmem:[#allocation2 + $0x260] ss:$12 sps:$4 sm:$0xff]   ;;  %v2253_v61 = vld [vmem:[#allocation2 + $0x198] ss:$12 sps:$4 sm:$0xff]  }
  0x2b   :  { %317 = vmatprep.mubr.bf16.mxu1 %v2339_v0  ;;  %1879 = vmatpush3.bf16.msra.mxu1 %v2220_v40  ;;  %v2250_v16 = vld [vmem:[#allocation2 + $0x184] ss:$12 sps:$4 sm:$0xff]  }
  0x2c   :  { %1880 = vmatprep.subr.bf16.mxu1 %v2227_v46 }
  0x2d   :  { %1132 = vmatpush1.bf16.msra.mxu0 %v2205_v38 }
  0x2e   :  { %1133 = vmatprep.subr.bf16.mxu0 %v2210_v42 }
  0x2f   :  { %1881 = vmatpush3.bf16.msra.mxu1 %v2228_v47 }
  0x30   :  { %1760 = vmatmul.mubr.msk.bf16.gmra.mrb[12].mxu0 %vm104_vm1, %v57_v37  ;;  %1882 = vmatprep.subr.bf16.mxu1 %v2235_v52 }
  0x31   :  { %214 = vmatprep.mubr.bf16.mxu0 %v2339_v0  ;;  %1134 = vmatpush1.bf16.msra.mxu0 %v2208_v44  ;;  %v2248_v44 = vld [vmem:[#allocation2 + $0x180] ss:$12 sps:$4 sm:$0xff]  }
  0x32   :  { %1769 = vmatmul.mubr.msk.bf16.gmra.mrb[12].mxu1 %vm104_vm1, %v57_v37  ;;  %1135 = vmatprep.subr.bf16.mxu0 %v2215_v45  ;;  %v2252_v45 = vld [vmem:[#allocation2 + $0x188] ss:$12 sps:$4 sm:$0xff]  }
  0x33   :  { %327 = vmatprep.mubr.bf16.mxu1 %v2339_v0  ;;  %1883 = vmatpush3.bf16.msra.mxu1 %v2236_v53 }
  0x34   :  { %1884 = vmatprep.subr.bf16.mxu1 %v2243_v12 }
  0x35   :  { %1136 = vmatpush1.bf16.msra.mxu0 %v2213_v49 }
  0x36   :  { %1137 = vmatprep.subr.bf16.mxu0 %v2218_v50  ;;  %v2255_v50 = vld [vmem:[#allocation2 + $0x19c] ss:$12 sps:$4 sm:$0xff]  }
  0x37   :  { %1885 = vmatpush3.bf16.msra.mxu1 %v2244_v14 }
  0x38   :  { %1761 = vmatmul.mubr.msk.bf16.gmra.mrb[16].mxu0 %vm104_vm1, %v58_v48  ;;  %1934 = vmatprep.subr.bf16.mxu1 %v2251_v17  ;;  %v2256_v17 = vld [vmem:[#allocation2 + $0x1b0] ss:$12 sps:$4 sm:$0xff]  }
  0x39   :  { %224 = vmatprep.mubr.bf16.mxu0 %v2339_v0  ;;  %1138 = vmatpush1.bf16.msra.mxu0 %v2216_v55 }
  0x3a   :  { %1770 = vmatmul.mubr.msk.bf16.gmra.mrb[16].mxu1 %vm104_vm1, %v58_v48  ;;  %1139 = vmatprep.subr.bf16.mxu0 %v2223_v56 }
  0x3b   :  { %337 = vmatprep.mubr.bf16.mxu1 %v2339_v0 }
  0x3d   :  { %1140 = vmatpush1.bf16.msra.mxu0 %v2221_v58 }
  0x3e   :  { %1141 = vmatprep.subr.bf16.mxu0 %v2226_v59 }
  0x40   :  { %1762 = vmatmul.mubr.msk.bf16.gmra.mrb[20].mxu0 %vm104_vm1, %v59_v57 }
  0x41   :  { %234 = vmatprep.mubr.bf16.mxu0 %v2339_v0  ;;  %1142 = vmatpush1.bf16.msra.mxu0 %v2224_v62 }
  0x42   :  { %1771 = vmatmul.mubr.msk.bf16.gmra.mrb[20].mxu1 %vm104_vm1, %v59_v57  ;;  %1143 = vmatprep.subr.bf16.mxu0 %v2231_v63 }
  0x43   :  { %347 = vmatprep.mubr.bf16.mxu1 %v2339_v0 }
  0x45   :  { %1144 = vmatpush1.bf16.msra.mxu0 %v2229_v2  ;;  %v2258_v2 = vld [vmem:[#allocation2 + $0x1b4] ss:$12 sps:$4 sm:$0xff]  }
  0x46   :  { %1145 = vmatprep.subr.bf16.mxu0 %v2234_v3  ;;  %v2260_v3 = vld [vmem:[#allocation2 + $0x1a0] ss:$12 sps:$4 sm:$0xff]  }
  0x48   :  { %1763 = vmatmul.mubr.msk.bf16.gmra.mrb[24].mxu0 %vm104_vm1, %v60_v1 }
  0x49   :  { %244 = vmatprep.mubr.bf16.mxu0 %v2339_v0  ;;  %1146 = vmatpush1.bf16.msra.mxu0 %v2232_v6 }
  0x4a   :  { %1772 = vmatmul.mubr.msk.bf16.gmra.mrb[24].mxu1 %vm104_vm1, %v60_v1  ;;  %1147 = vmatprep.subr.bf16.mxu0 %v2239_v7  ;;  %v2267_v7 = vld [vmem:[#allocation2 + $0x278] ss:$12 sps:$4 sm:$0xff]  }
  0x4b   :  { %357 = vmatprep.mubr.bf16.mxu1 %v2339_v0  ;;  %v68_v0 = vlaneseq }
  0x4d   :  { %1148 = vmatpush1.bf16.msra.mxu0 %v2237_v9  ;;  %v69_v18 = vshrl.u32 %v68_v0, 7  ;;  %v2268_v0 = vld [vmem:[#allocation2 + $0x1b8] ss:$12 sps:$4 sm:$0xff]  }
  0x4e   :  { %1149 = vmatprep.subr.bf16.mxu0 %v2242_v10 }
  0x4f   :  { %v2486_v19 = vsub.s32 0, %v69_v18  ;;  %v2491_v21 = vsub.s32 1, %v69_v18  ;;  %v2499_v25 = vsub.s32 2, %v69_v18  ;;  %v82_v28 = vsub.s32 3, %v69_v18 }
  0x50   :  { %1764 = vmatmul.mubr.msk.bf16.gmra.mrb[28].mxu0 %vm104_vm1, %v61_v8 }
  0x51   :  { %1150 = vmatpush1.bf16.msra.mxu0 %v2240_v11  ;;  %v2494_v22 = vrot.slane %v66_v20, %v2486_v19  ;;  %v2497_v23 = vrot.slane %v66_v20, %v2491_v21  ;;  %v2506_v34 = vrot.slane %v66_v20, %v2499_v25  ;;  %v2508_v37 = vrot.slane %v66_v20, %v82_v28  ;;  %v2275_v28 = vld [vmem:[#allocation2 + $0x290] ss:$12 sps:$4 sm:$0xff]  }
  0x52   :  { %1773 = vmatmul.mubr.msk.bf16.gmra.mrb[28].mxu1 %vm104_vm1, %v61_v8  ;;  %1151 = vmatprep.subr.bf16.mxu0 %v2247_v13 }
  0x55   :  { %1152 = vmatpush1.bf16.msra.mxu0 %v2245_v15 }
  0x56   :  { %1234 = vmatprep.subr.bf16.mxu0 %v2250_v16 }
  0xeb   :  { %v176_v24 = vpop.f32.mrb[0].mxu0 }
  0xec   :  { %v177_v26 = vadd.f32 %v176_v24, %v2494_v22  ;;  %v178_v27 = vpop.f32.mrb[1].mxu0 }
  0xed   :  { %v179_v29 = vadd.f32 %v178_v27, %v2497_v23  ;;  %v180_v30 = vpop.f32.mrb[2].mxu0  ;;  %v289_v41 = vpop.f32.mrb[0].mxu1  ;;  %v2263_v27 = vld [vmem:[#allocation2 + $0x1cc] ss:$12 sps:$4 sm:$0xff]  }
  0xee   :  { %v181_v31 = vadd.f32 %v180_v30, %v2494_v22  ;;  %v182_v32 = vpop.f32.mrb[3].mxu0  ;;  %v368_v35 = vmax.f32 %v177_v26, 0.0  ;;  %v290_v46 = vadd.f32 %v289_v41, %v2506_v34  ;;  %v291_v47 = vpop.f32.mrb[1].mxu1 }
  0xef   :  { %v183_v33 = vadd.f32 %v182_v32, %v2497_v23  ;;  %v369_v38 = vmax.f32 %v179_v29, 0.0  ;;  %v292_v52 = vadd.f32 %v291_v47, %v2508_v37  ;;  %v293_v53 = vpop.f32.mrb[2].mxu1 }
  0xf0   :  { %v372_v36 = vmax.f32 %v181_v31, 0.0  ;;  %v370_v56 = vmax.f32 %v290_v46, 0.0  ;;  %v294_v57 = vadd.f32 %v293_v53, %v2506_v34  ;;  %v295_v58 = vpop.f32.mrb[3].mxu1 }
  0xf1   :  { %v373_v39 = vmax.f32 %v183_v33, 0.0  ;;  %v371_v62 = vmax.f32 %v292_v52, 0.0  ;;  %v296_v63 = vadd.f32 %v295_v58, %v2508_v37 }
  0xf2   :  { %v432_v40 = vpack.c.bf16 %v372_v36, %v368_v35  ;;  %v374_v4 = vmax.f32 %v294_v57, 0.0 }
  0xf3   :  { %v433_v42 = vpack.c.bf16 %v373_v39, %v369_v38  ;;  %v186_v43 = vpop.f32.mrb[4].mxu0  ;;  %v375_v8 = vmax.f32 %v296_v63, 0.0 }
  0xf4   :  { %v187_v48 = vadd.f32 %v186_v43, %v2494_v22  ;;  %v188_v49 = vpop.f32.mrb[5].mxu0  ;;  %v2518_v11 = vpack.c.bf16 %v374_v4, %v370_v56 }
  0xf5   :  { %v189_v54 = vadd.f32 %v188_v49, %v2497_v23  ;;  %v190_v55 = vpop.f32.mrb[6].mxu0  ;;  %1153 = vmatprep.mubr.bf16.mxu0 %v433_v42  ;;  %1379 = vmatprep.mubr.bf16.mxu1 %v433_v42  ;;  %v2520_v13 = vpack.c.bf16 %v375_v8, %v371_v62  ;;  %v299_v14 = vpop.f32.mrb[4].mxu1  ;;  %v2283_v49 = vld [vmem:[#allocation2 + $0x2a8] ss:$12 sps:$4 sm:$0xff]  }
  0xf6   :  { %v191_v59 = vadd.f32 %v190_v55, %v2494_v22  ;;  %v192_v60 = vpop.f32.mrb[7].mxu0  ;;  %1154 = vmatmul.mubr.bf16.vlgmr.msra.gmra.mrb[32].mxu0 %v432_v40  ;;  %1380 = vmatmul.mubr.bf16.vlgmr.msra.gmra.mrb[32].mxu1 %v432_v40  ;;  %v376_v5 = vmax.f32 %v187_v48, 0.0  ;;  %v300_v18 = vadd.f32 %v299_v14, %v2506_v34  ;;  %v301_v20 = vpop.f32.mrb[5].mxu1  ;;  %v2261_v40 = vld [vmem:[#allocation2 + $0x1c8] ss:$12 sps:$4 sm:$0xff]  }
  0xf7   :  { %v193_v1 = vadd.f32 %v192_v60, %v2497_v23  ;;  %1235 = vmatpush1.bf16.msra.mxu0 %v2248_v44  ;;  %1935 = vmatpush3.bf16.msra.mxu1 %v2252_v45  ;;  %v377_v9 = vmax.f32 %v189_v54, 0.0  ;;  %v302_v29 = vadd.f32 %v301_v20, %v2508_v37  ;;  %v303_v30 = vpop.f32.mrb[6].mxu1  ;;  %v2266_v44 = vld [vmem:[#allocation2 + $0x1e4] ss:$12 sps:$4 sm:$0xff]   ;;  %v2284_v60 = vld [vmem:[#allocation2 + $0x1e8] ss:$12 sps:$4 sm:$0xff]  }
  0xf8   :  { %v380_v6 = vmax.f32 %v191_v59, 0.0  ;;  %1236 = vmatprep.subr.bf16.mxu0 %v2255_v50  ;;  %1936 = vmatprep.subr.bf16.mxu1 %v2259_v51  ;;  %v378_v33 = vmax.f32 %v300_v18, 0.0  ;;  %v304_v35 = vadd.f32 %v303_v30, %v2506_v34  ;;  %v305_v36 = vpop.f32.mrb[7].mxu1  ;;  %v2276_v45 = vld [vmem:[#allocation2 + $0x1d0] ss:$12 sps:$4 sm:$0xff]  }
  0xf9   :  { %v381_v10 = vmax.f32 %v193_v1, 0.0  ;;  %v379_v41 = vmax.f32 %v302_v29, 0.0  ;;  %v306_v42 = vadd.f32 %v305_v36, %v2508_v37  ;;  %v2264_v59 = vld [vmem:[#allocation2 + $0x1e0] ss:$12 sps:$4 sm:$0xff]  }
  0xfa   :  { %v436_v12 = vpack.c.bf16 %v380_v6, %v376_v5  ;;  %v382_v46 = vmax.f32 %v304_v35, 0.0  ;;  %v2274_v18 = vld [vmem:[#allocation2 + $0x214] ss:$12 sps:$4 sm:$0xff]  }
  0xfb   :  { %v437_v15 = vpack.c.bf16 %v381_v10, %v377_v9  ;;  %v196_v16 = vpop.f32.mrb[8].mxu0  ;;  %1237 = vmatpush1.bf16.msra.mxu0 %v2253_v61  ;;  %1937 = vmatpush3.bf16.msra.mxu1 %v2260_v3  ;;  %v383_v50 = vmax.f32 %v306_v42, 0.0  ;;  %v2291_v3 = vld [vmem:[#allocation2 + $0x2c0] ss:$12 sps:$4 sm:$0xff]  }
  0xfc   :  { %v197_v24 = vadd.f32 %v196_v16, %v2494_v22  ;;  %v198_v26 = vpop.f32.mrb[9].mxu0  ;;  %1238 = vmatprep.subr.bf16.mxu0 %v2258_v2  ;;  %1938 = vmatprep.subr.bf16.mxu1 %v2267_v7  ;;  %v2530_v53 = vpack.c.bf16 %v382_v46, %v378_v33  ;;  %v2271_v2 = vld [vmem:[#allocation2 + $0x1fc] ss:$12 sps:$4 sm:$0xff]   ;;  %v2292_v20 = vld [vmem:[#allocation2 + $0x200] ss:$12 sps:$4 sm:$0xff]  }
  0xfd   :  { %v199_v31 = vadd.f32 %v198_v26, %v2497_v23  ;;  %v200_v32 = vpop.f32.mrb[10].mxu0  ;;  %1163 = vmatprep.mubr.bf16.mxu0 %v437_v15  ;;  %1387 = vmatprep.mubr.bf16.mxu1 %v437_v15  ;;  %v2532_v55 = vpack.c.bf16 %v383_v50, %v379_v41  ;;  %v309_v56 = vpop.f32.mrb[8].mxu1  ;;  %v2269_v15 = vld [vmem:[#allocation2 + $0x1f8] ss:$12 sps:$4 sm:$0xff]  }
  0xfe   :  { %v201_v38 = vadd.f32 %v200_v32, %v2494_v22  ;;  %v202_v39 = vpop.f32.mrb[11].mxu0  ;;  %1164 = vmatmul.mubr.bf16.gmra.mrb[36].mxu0 %v436_v12  ;;  %1388 = vmatmul.mubr.bf16.gmra.mrb[36].mxu1 %v436_v12  ;;  %v384_v47 = vmax.f32 %v197_v24, 0.0  ;;  %v310_v61 = vadd.f32 %v309_v56, %v2506_v34  ;;  %v311_v62 = vpop.f32.mrb[9].mxu1  ;;  %v2300_v41 = vld [vmem:[#allocation2 + $0x218] ss:$12 sps:$4 sm:$0xff]  }
  0xff   :  { %v203_v43 = vadd.f32 %v202_v39, %v2497_v23  ;;  %1239 = vmatpush1.bf16.msra.mxu0 %v2256_v17  ;;  %1939 = vmatpush3.bf16.msra.mxu1 %v2268_v0  ;;  %v385_v51 = vmax.f32 %v199_v31, 0.0  ;;  %v312_v4 = vadd.f32 %v311_v62, %v2508_v37  ;;  %v313_v5 = vpop.f32.mrb[10].mxu1  ;;  %v2279_v46 = vld [vmem:[#allocation2 + $0x22c] ss:$12 sps:$4 sm:$0xff]   ;;  %v2277_v62 = vld [vmem:[#allocation2 + $0x228] ss:$12 sps:$4 sm:$0xff]  }
 0x100   :  { %v388_v48 = vmax.f32 %v201_v38, 0.0  ;;  %1240 = vmatprep.subr.bf16.mxu0 %v2263_v27  ;;  %1940 = vmatprep.subr.bf16.mxu1 %v2275_v28  ;;  %v386_v8 = vmax.f32 %v310_v61, 0.0  ;;  %v314_v9 = vadd.f32 %v313_v5, %v2506_v34  ;;  %v315_v10 = vpop.f32.mrb[11].mxu1  ;;  %v2299_v28 = vld [vmem:[#allocation2 + $0x2d8] ss:$12 sps:$4 sm:$0xff]  }
 0x101   :  { %v389_v52 = vmax.f32 %v203_v43, 0.0  ;;  %v387_v16 = vmax.f32 %v312_v4, 0.0  ;;  %v316_v17 = vadd.f32 %v315_v10, %v2508_v37  ;;  %v2282_v4 = vld [vmem:[#allocation2 + $0x244] ss:$12 sps:$4 sm:$0xff]  }
 0x102   :  { %v440_v54 = vpack.c.bf16 %v388_v48, %v384_v47  ;;  %v390_v24 = vmax.f32 %v314_v9, 0.0  ;;  %v2307_v47 = vld [vmem:[#allocation2 + $0x2f0] ss:$12 sps:$4 sm:$0xff]  }
 0x103   :  { %v441_v57 = vpack.c.bf16 %v389_v52, %v385_v51  ;;  %v206_v58 = vpop.f32.mrb[12].mxu0  ;;  %1241 = vmatpush1.bf16.msra.mxu0 %v2261_v40  ;;  %1941 = vmatpush3.bf16.msra.mxu1 %v2276_v45  ;;  %v391_v29 = vmax.f32 %v316_v17, 0.0  ;;  %v2272_v40 = vld [vmem:[#allocation2 + $0x210] ss:$12 sps:$4 sm:$0xff]  }
 0x104   :  { %v207_v63 = vadd.f32 %v206_v58, %v2494_v22  ;;  %v208_v1 = vpop.f32.mrb[13].mxu0  ;;  %1242 = vmatprep.subr.bf16.mxu0 %v2266_v44  ;;  %1942 = vmatprep.subr.bf16.mxu1 %v2283_v49  ;;  %v2542_v32 = vpack.c.bf16 %v390_v24, %v386_v8  ;;  %v2287_v24 = vld [vmem:[#allocation2 + $0x25c] ss:$12 sps:$4 sm:$0xff]  }
 0x105   :  { %v209_v6 = vadd.f32 %v208_v1, %v2497_v23  ;;  %v210_v7 = vpop.f32.mrb[14].mxu0  ;;  %1173 = vmatprep.mubr.bf16.mxu0 %v441_v57  ;;  %1395 = vmatprep.mubr.bf16.mxu1 %v441_v57  ;;  %v2544_v35 = vpack.c.bf16 %v391_v29, %v387_v16  ;;  %v319_v36 = vpop.f32.mrb[12].mxu1  ;;  %v2280_v16 = vld [vmem:[#allocation2 + $0x240] ss:$12 sps:$4 sm:$0xff]  }
 0x106   :  { %v211_v12 = vadd.f32 %v210_v7, %v2494_v22  ;;  %v212_v14 = vpop.f32.mrb[15].mxu0  ;;  %1174 = vmatmul.mubr.bf16.gmra.mrb[40].mxu0 %v440_v54  ;;  %1396 = vmatmul.mubr.bf16.gmra.mrb[40].mxu1 %v440_v54  ;;  %v392_v26 = vmax.f32 %v207_v63, 0.0  ;;  %v320_v42 = vadd.f32 %v319_v36, %v2506_v34  ;;  %v321_v43 = vpop.f32.mrb[13].mxu1  ;;  %v2308_v63 = vld [vmem:[#allocation2 + $0x230] ss:$12 sps:$4 sm:$0xff]  }
 0x107   :  { %v213_v0 = vadd.f32 %v212_v14, %v2497_v23  ;;  %1243 = vmatpush1.bf16.msra.mxu0 %v2264_v59  ;;  %1943 = vmatpush3.bf16.msra.mxu1 %v2284_v60  ;;  %v393_v30 = vmax.f32 %v209_v6, 0.0  ;;  %v322_v48 = vadd.f32 %v321_v43, %v2508_v37  ;;  %v323_v49 = vpop.f32.mrb[14].mxu1 }
 0x108   :  { %v396_v27 = vmax.f32 %v211_v12, 0.0  ;;  %1244 = vmatprep.subr.bf16.mxu0 %v2271_v2  ;;  %1944 = vmatprep.subr.bf16.mxu1 %v2291_v3  ;;  %v394_v52 = vmax.f32 %v320_v42, 0.0  ;;  %v324_v54 = vadd.f32 %v323_v49, %v2506_v34  ;;  %v325_v56 = vpop.f32.mrb[15].mxu1  ;;  %v2285_v42 = vld [vmem:[#allocation2 + $0x258] ss:$12 sps:$4 sm:$0xff]  }
 0x109   :  { %v397_v31 = vmax.f32 %v213_v0, 0.0  ;;  %v395_v59 = vmax.f32 %v322_v48, 0.0  ;;  %v326_v60 = vadd.f32 %v325_v56, %v2508_v37 }
 0x10a   :  { %v444_v33 = vpack.c.bf16 %v396_v27, %v392_v26  ;;  %v398_v1 = vmax.f32 %v324_v54, 0.0 }
 0x10b   :  { %v445_v38 = vpack.c.bf16 %v397_v31, %v393_v30  ;;  %v216_v39 = vpop.f32.mrb[16].mxu0  ;;  %1245 = vmatpush1.bf16.msra.mxu0 %v2269_v15  ;;  %1945 = vmatpush3.bf16.msra.mxu1 %v2292_v20  ;;  %v399_v5 = vmax.f32 %v326_v60, 0.0 }
 0x10c   :  { %v217_v44 = vadd.f32 %v216_v39, %v2494_v22  ;;  %v218_v45 = vpop.f32.mrb[17].mxu0  ;;  %1246 = vmatprep.subr.bf16.mxu0 %v2274_v18  ;;  %1946 = vmatprep.subr.bf16.mxu1 %v2299_v28  ;;  %v2554_v8 = vpack.c.bf16 %v398_v1, %v394_v52 }
 0x10d   :  { %v219_v50 = vadd.f32 %v218_v45, %v2497_v23  ;;  %v220_v51 = vpop.f32.mrb[18].mxu0  ;;  %1183 = vmatprep.mubr.bf16.mxu0 %v445_v38  ;;  %1403 = vmatprep.mubr.bf16.mxu1 %v445_v38  ;;  %v2556_v10 = vpack.c.bf16 %v399_v5, %v395_v59  ;;  %v329_v12 = vpop.f32.mrb[16].mxu1 }
 0x10e   :  { %v221_v57 = vadd.f32 %v220_v51, %v2494_v22  ;;  %v222_v58 = vpop.f32.mrb[19].mxu0  ;;  %1184 = vmatmul.mubr.bf16.gmra.mrb[44].mxu0 %v444_v33  ;;  %1404 = vmatmul.mubr.bf16.gmra.mrb[44].mxu1 %v444_v33  ;;  %v400_v2 = vmax.f32 %v217_v44, 0.0  ;;  %v330_v17 = vadd.f32 %v329_v12, %v2506_v34  ;;  %v331_v0 = vpop.f32.mrb[17].mxu1 }
 0x10f   :  { %v223_v61 = vadd.f32 %v222_v58, %v2497_v23  ;;  %1247 = vmatpush1.bf16.msra.mxu0 %v2272_v40  ;;  %1947 = vmatpush3.bf16.msra.mxu1 %v2300_v41  ;;  %v401_v6 = vmax.f32 %v219_v50, 0.0  ;;  %v332_v26 = vadd.f32 %v331_v0, %v2508_v37  ;;  %v333_v27 = vpop.f32.mrb[18].mxu1  ;;  %v2288_v58 = vld [vmem:[#allocation2 + $0x270] ss:$12 sps:$4 sm:$0xff]  }
 0x110   :  { %v404_v3 = vmax.f32 %v221_v57, 0.0  ;;  %1248 = vmatprep.subr.bf16.mxu0 %v2279_v46  ;;  %1948 = vmatprep.subr.bf16.mxu1 %v2307_v47  ;;  %v402_v30 = vmax.f32 %v330_v17, 0.0  ;;  %v334_v31 = vadd.f32 %v333_v27, %v2506_v34  ;;  %v335_v33 = vpop.f32.mrb[19].mxu1  ;;  %v2290_v46 = vld [vmem:[#allocation2 + $0x274] ss:$12 sps:$4 sm:$0xff]  }
 0x111   :  { %v405_v7 = vmax.f32 %v223_v61, 0.0  ;;  %v403_v39 = vmax.f32 %v332_v26, 0.0  ;;  %v336_v40 = vadd.f32 %v335_v33, %v2508_v37  ;;  %v2293_v17 = vld [vmem:[#allocation2 + $0x288] ss:$12 sps:$4 sm:$0xff]  }
 0x112   :  { %v448_v9 = vpack.c.bf16 %v404_v3, %v400_v2  ;;  %v406_v43 = vmax.f32 %v334_v31, 0.0 }
 0x113   :  { %v449_v14 = vpack.c.bf16 %v405_v7, %v401_v6  ;;  %v226_v15 = vpop.f32.mrb[20].mxu0  ;;  %1249 = vmatpush1.bf16.msra.mxu0 %v2277_v62  ;;  %1949 = vmatpush3.bf16.msra.mxu1 %v2308_v63  ;;  %v407_v47 = vmax.f32 %v336_v40, 0.0  ;;  %v2295_v63 = vld [vmem:[#allocation2 + $0x28c] ss:$12 sps:$4 sm:$0xff]  }
 0x114   :  { %v227_v18 = vadd.f32 %v226_v15, %v2494_v22  ;;  %v228_v20 = vpop.f32.mrb[21].mxu0  ;;  %1250 = vmatprep.subr.bf16.mxu0 %v2282_v4  ;;  %v2566_v50 = vpack.c.bf16 %v406_v43, %v402_v30 }
 0x115   :  { %v229_v28 = vadd.f32 %v228_v20, %v2497_v23  ;;  %v230_v29 = vpop.f32.mrb[22].mxu0  ;;  %1193 = vmatprep.mubr.bf16.mxu0 %v449_v14  ;;  %1411 = vmatprep.mubr.bf16.mxu1 %v449_v14  ;;  %v2568_v52 = vpack.c.bf16 %v407_v47, %v403_v39  ;;  %v339_v54 = vpop.f32.mrb[20].mxu1  ;;  %v2296_v39 = vld [vmem:[#allocation2 + $0x2a0] ss:$12 sps:$4 sm:$0xff]  }
 0x116   :  { %v231_v36 = vadd.f32 %v230_v29, %v2494_v22  ;;  %v232_v38 = vpop.f32.mrb[23].mxu0  ;;  %1194 = vmatmul.mubr.bf16.gmra.mrb[48].mxu0 %v448_v9  ;;  %1412 = vmatmul.mubr.bf16.gmra.mrb[48].mxu1 %v448_v9  ;;  %v408_v44 = vmax.f32 %v227_v18, 0.0  ;;  %v340_v59 = vadd.f32 %v339_v54, %v2506_v34  ;;  %v341_v60 = vpop.f32.mrb[21].mxu1 }
 0x117   :  { %v233_v41 = vadd.f32 %v232_v38, %v2497_v23  ;;  %1251 = vmatpush1.bf16.msra.mxu0 %v2280_v16  ;;  %v409_v48 = vmax.f32 %v229_v28, 0.0  ;;  %v342_v1 = vadd.f32 %v341_v60, %v2508_v37  ;;  %v343_v2 = vpop.f32.mrb[22].mxu1 }
 0x118   :  { %v412_v45 = vmax.f32 %v231_v36, 0.0  ;;  %1252 = vmatprep.subr.bf16.mxu0 %v2287_v24  ;;  %v410_v5 = vmax.f32 %v340_v59, 0.0  ;;  %v344_v6 = vadd.f32 %v343_v2, %v2506_v34  ;;  %v345_v7 = vpop.f32.mrb[23].mxu1  ;;  %v2298_v24 = vld [vmem:[#allocation2 + $0x2a4] ss:$12 sps:$4 sm:$0xff]  }
 0x119   :  { %v413_v49 = vmax.f32 %v233_v41, 0.0  ;;  %v411_v14 = vmax.f32 %v342_v1, 0.0  ;;  %v346_v15 = vadd.f32 %v345_v7, %v2508_v37  ;;  %v2306_v2 = vld [vmem:[#allocation2 + $0x2d4] ss:$12 sps:$4 sm:$0xff]  }
 0x11a   :  { %v452_v51 = vpack.c.bf16 %v412_v45, %v408_v44  ;;  %v414_v0 = vmax.f32 %v344_v6, 0.0  ;;  %v2303_v44 = vld [vmem:[#allocation2 + $0x2bc] ss:$12 sps:$4 sm:$0xff]  }
 0x11b   :  { %v453_v56 = vpack.c.bf16 %v413_v49, %v409_v48  ;;  %v236_v57 = vpop.f32.mrb[24].mxu0  ;;  %1253 = vmatpush1.bf16.msra.mxu0 %v2285_v42  ;;  %v415_v26 = vmax.f32 %v346_v15, 0.0 }
 0x11c   :  { %v237_v61 = vadd.f32 %v236_v57, %v2494_v22  ;;  %v238_v62 = vpop.f32.mrb[25].mxu0  ;;  %1254 = vmatprep.subr.bf16.mxu0 %v2290_v46  ;;  %v2578_v29 = vpack.c.bf16 %v414_v0, %v410_v5 }
 0x11d   :  { %v239_v3 = vadd.f32 %v238_v62, %v2497_v23  ;;  %v240_v4 = vpop.f32.mrb[26].mxu0  ;;  %1203 = vmatprep.mubr.bf16.mxu0 %v453_v56  ;;  %1419 = vmatprep.mubr.bf16.mxu1 %v453_v56  ;;  %v2580_v31 = vpack.c.bf16 %v415_v26, %v411_v14  ;;  %v349_v33 = vpop.f32.mrb[24].mxu1  ;;  %v2304_v14 = vld [vmem:[#allocation2 + $0x2d0] ss:$12 sps:$4 sm:$0xff]  }
 0x11e   :  { %v241_v9 = vadd.f32 %v240_v4, %v2494_v22  ;;  %v242_v12 = vpop.f32.mrb[27].mxu0  ;;  %1204 = vmatmul.mubr.bf16.gmra.mrb[52].mxu0 %v452_v51  ;;  %1420 = vmatmul.mubr.bf16.gmra.mrb[52].mxu1 %v452_v51  ;;  %v416_v18 = vmax.f32 %v237_v61, 0.0  ;;  %v350_v40 = vadd.f32 %v349_v33, %v2506_v34  ;;  %v351_v41 = vpop.f32.mrb[25].mxu1  ;;  %v2301_v61 = vld [vmem:[#allocation2 + $0x2b8] ss:$12 sps:$4 sm:$0xff]  }
 0x11f   :  { %v243_v16 = vadd.f32 %v242_v12, %v2497_v23  ;;  %1255 = vmatpush1.bf16.msra.mxu0 %v2288_v58  ;;  %v417_v27 = vmax.f32 %v239_v3, 0.0  ;;  %v352_v45 = vadd.f32 %v351_v41, %v2508_v37  ;;  %v353_v46 = vpop.f32.mrb[26].mxu1 }
 0x120   :  { %v420_v20 = vmax.f32 %v241_v9, 0.0  ;;  %1256 = vmatprep.subr.bf16.mxu0 %v2295_v63  ;;  %v418_v49 = vmax.f32 %v350_v40, 0.0  ;;  %v354_v51 = vadd.f32 %v353_v46, %v2506_v34  ;;  %v355_v54 = vpop.f32.mrb[27].mxu1 }
 0x121   :  { %v421_v28 = vmax.f32 %v243_v16, 0.0  ;;  %v419_v58 = vmax.f32 %v352_v45, 0.0  ;;  %v356_v59 = vadd.f32 %v355_v54, %v2508_v37  ;;  %v2311_v16 = vld [vmem:[#allocation2 + $0x2ec] ss:$12 sps:$4 sm:$0xff]  }
 0x122   :  { %v456_v30 = vpack.c.bf16 %v420_v20, %v416_v18  ;;  %v422_v62 = vmax.f32 %v354_v51, 0.0 }
 0x123   :  { %v457_v36 = vpack.c.bf16 %v421_v28, %v417_v27  ;;  %v246_v38 = vpop.f32.mrb[28].mxu0  ;;  %1257 = vmatpush1.bf16.msra.mxu0 %v2293_v17  ;;  %v423_v3 = vmax.f32 %v356_v59, 0.0  ;;  %v2309_v28 = vld [vmem:[#allocation2 + $0x2e8] ss:$12 sps:$4 sm:$0xff]  }
 0x124   :  { %v247_v42 = vadd.f32 %v246_v38, %v2494_v22  ;;  %v248_v43 = vpop.f32.mrb[29].mxu0  ;;  %1258 = vmatprep.subr.bf16.mxu0 %v2298_v24  ;;  %v458_v6 = vpack.c.bf16 %v422_v62, %v418_v49 }
 0x125   :  { %v249_v47 = vadd.f32 %v248_v43, %v2497_v23  ;;  %v250_v48 = vpop.f32.mrb[30].mxu0  ;;  %1213 = vmatprep.mubr.bf16.mxu0 %v457_v36  ;;  %1427 = vmatprep.mubr.bf16.mxu1 %v457_v36  ;;  %v459_v7 = vpack.c.bf16 %v423_v3, %v419_v58  ;;  %v359_v9 = vpop.f32.mrb[28].mxu1 }
 0x126   :  { %v251_v56 = vadd.f32 %v250_v48, %v2494_v22  ;;  %v252_v57 = vpop.f32.mrb[31].mxu0  ;;  %1214 = vmatmul.mubr.bf16.gmra.mrb[56].mxu0 %v456_v30  ;;  %1428 = vmatmul.mubr.bf16.gmra.mrb[56].mxu1 %v456_v30  ;;  %v424_v63 = vmax.f32 %v247_v42, 0.0  ;;  %v360_v15 = vadd.f32 %v359_v9, %v2506_v34 }
 0x127   :  { %v253_v60 = vadd.f32 %v252_v57, %v2497_v23  ;;  %1259 = vmatpush1.bf16.msra.mxu0 %v2296_v39  ;;  %v425_v4 = vmax.f32 %v249_v47, 0.0  ;;  %v361_v23 = vpop.f32.mrb[29].mxu1 }
 0x128   :  { %v428_v1 = vmax.f32 %v251_v56, 0.0  ;;  %1260 = vmatprep.subr.bf16.mxu0 %v2303_v44  ;;  %v362_v17 = vadd.f32 %v361_v23, %v2508_v37  ;;  %v363_v0 = vpop.f32.mrb[30].mxu1  ;;  %v426_v18 = vmax.f32 %v360_v15, 0.0 }
 0x129   :  { %v429_v5 = vmax.f32 %v253_v60, 0.0  ;;  %v364_v20 = vadd.f32 %v363_v0, %v2506_v34  ;;  %v365_v24 = vpop.f32.mrb[31].mxu1  ;;  %v2340_v34 = vmov 0.0|0.0   ;;  %v592_v0 = vld [vmem:[%s2749_s4] sm:$0x7] }
 0x12a   :  { %v460_v22 = vpack.c.bf16 %v428_v1, %v424_v63  ;;  %v427_v26 = vmax.f32 %v362_v17, 0.0  ;;  %v366_v27 = vadd.f32 %v365_v24, %v2508_v37  ;;  %v2660_v24 = vrot.slane %v592_v0, %v2486_v19 }
 0x12b   :  { %v461_v12 = vpack.c.bf16 %v429_v5, %v425_v4  ;;  %1261 = vmatpush1.bf16.msra.mxu0 %v2301_v61  ;;  %v430_v30 = vmax.f32 %v364_v20, 0.0 }
 0x12c   :  { %1262 = vmatprep.subr.bf16.mxu0 %v2306_v2  ;;  %v431_v33 = vmax.f32 %v366_v27, 0.0  ;;  %v2666_v27 = vrot.slane %v592_v0, %v2491_v21 }
 0x12d   :  { %1223 = vmatprep.mubr.bf16.mxu0 %v461_v12  ;;  %1435 = vmatprep.mubr.bf16.mxu1 %v461_v12  ;;  %v462_v36 = vpack.c.bf16 %v430_v30, %v426_v18 }
 0x12e   :  { %1224 = vmatmul.mubr.bf16.gmra.mrb[60].mxu0 %v460_v22  ;;  %1436 = vmatmul.mubr.bf16.gmra.mrb[60].mxu1 %v460_v22  ;;  %v463_v38 = vpack.c.bf16 %v431_v33, %v427_v26  ;;  %v2663_v26 = vrot.slane %v592_v0, %v2499_v25 }
 0x12f   :  { %1263 = vmatpush1.bf16.msra.mxu0 %v2304_v14  ;;  %1266 = vmatprep.mubr.bf16.mxu0 %v2520_v13 }
 0x130   :  { %1264 = vmatprep.subr.bf16.mxu0 %v2311_v16  ;;  %1476 = vmatprep.mubr.bf16.mxu1 %v2520_v13 }
 0x133   :  { %1265 = vmatpush1.bf16.msra.mxu0 %v2309_v28 }
 0x134   :  { %2082 = vmatprep.subr.bf16.mxu0 %v2340_v34 }
 0x136   :  { %1267 = vmatmul.mubr.bf16.vlgmr.msra.gmra.mrb[32].mxu0 %v2518_v11  ;;  %1477 = vmatmul.mubr.bf16.vlgmr.msra.gmra.mrb[64].mxu1 %v2518_v11 }
 0x137   :  { %1276 = vmatprep.mubr.bf16.mxu0 %v2532_v55  ;;  %1484 = vmatprep.mubr.bf16.mxu1 %v2532_v55 }
 0x13e   :  { %1277 = vmatmul.mubr.bf16.gmra.mrb[36].mxu0 %v2530_v53  ;;  %1485 = vmatmul.mubr.bf16.gmra.mrb[68].mxu1 %v2530_v53 }
 0x13f   :  { %1286 = vmatprep.mubr.bf16.mxu0 %v2544_v35  ;;  %1492 = vmatprep.mubr.bf16.mxu1 %v2544_v35  ;;  %v2624_v35 = vld [vmem:[%s2750_s5] sm:$0x7] }
 0x146   :  { %1287 = vmatmul.mubr.bf16.gmra.mrb[40].mxu0 %v2542_v32  ;;  %1493 = vmatmul.mubr.bf16.gmra.mrb[72].mxu1 %v2542_v32 }
 0x147   :  { %1296 = vmatprep.mubr.bf16.mxu0 %v2556_v10  ;;  %1500 = vmatprep.mubr.bf16.mxu1 %v2556_v10  ;;  %v2342_v10 = vmov 0.0  }
 0x14e   :  { %1297 = vmatmul.mubr.bf16.gmra.mrb[44].mxu0 %v2554_v8  ;;  %1501 = vmatmul.mubr.bf16.gmra.mrb[76].mxu1 %v2554_v8  ;;  %v1598_v8 = vrot.slane %v2624_v35, %v2491_v21 }
 0x14f   :  { %1306 = vmatprep.mubr.bf16.mxu0 %v2568_v52  ;;  %1508 = vmatprep.mubr.bf16.mxu1 %v2568_v52 }
 0x156   :  { %1307 = vmatmul.mubr.bf16.gmra.mrb[48].mxu0 %v2566_v50  ;;  %1509 = vmatmul.mubr.bf16.gmra.mrb[80].mxu1 %v2566_v50 }
 0x157   :  { %1316 = vmatprep.mubr.bf16.mxu0 %v2580_v31  ;;  %1516 = vmatprep.mubr.bf16.mxu1 %v2580_v31 }
 0x15e   :  { %1317 = vmatmul.mubr.bf16.gmra.mrb[52].mxu0 %v2578_v29  ;;  %1517 = vmatmul.mubr.bf16.gmra.mrb[84].mxu1 %v2578_v29 }
 0x15f   :  { %1326 = vmatprep.mubr.bf16.mxu0 %v459_v7  ;;  %1524 = vmatprep.mubr.bf16.mxu1 %v459_v7 }
 0x166   :  { %1327 = vmatmul.mubr.bf16.gmra.mrb[56].mxu0 %v458_v6  ;;  %1525 = vmatmul.mubr.bf16.gmra.mrb[88].mxu1 %v458_v6 }
 0x167   :  { %1336 = vmatprep.mubr.bf16.mxu0 %v463_v38  ;;  %1532 = vmatprep.mubr.bf16.mxu1 %v463_v38 }
 0x16e   :  { %1337 = vmatmul.mubr.bf16.gmra.mrb[60].mxu0 %v462_v36  ;;  %1533 = vmatmul.mubr.bf16.gmra.mrb[92].mxu1 %v462_v36 }
 0x16f   :  { %2047 = vmatprep.mubr.msk.f32.mxu0 %vm2341_vm2, %v2342_v10  ;;  %1670 = vmatprep.mubr.f32.mxu1 %v1598_v8 }
 0x1c9   :  { %v1886_v37 = vpop.f32.mrb[32].mxu1 }
 0x1ca   :  { %v1887_v11 = vpop.f32.mrb[33].mxu1 }
 0x1cb   :  { %v1888_v13 = vadd.f32 %v1887_v11, %v1886_v37  ;;  %v1889_v53 = vpop.f32.mrb[34].mxu1 }
 0x1cc   :  { %v1890_v55 = vpop.f32.mrb[35].mxu1 }
 0x1cd   :  { %v2619_v32 = vadd.f32 %v1890_v55, %v1889_v53  ;;  %v1382_v37 = vadd.f32 %v1888_v13, %v2663_v26 }
 0x1cf   :  { %v1385_v21 = vadd.f32 %v2619_v32, %v2663_v26 }
 0x1d1   :  { %v1892_v50 = vpop.f32.mrb[36].mxu1 }
 0x1d2   :  { %v1893_v52 = vpop.f32.mrb[37].mxu1 }
 0x1d3   :  { %v2628_v29 = vadd.f32 %v1893_v52, %v1892_v50  ;;  %v1895_v31 = vpop.f32.mrb[38].mxu1 }
 0x1d4   :  { %v1896_v39 = vpop.f32.mrb[39].mxu1 }
 0x1d5   :  { %v2630_v40 = vadd.f32 %v1896_v39, %v1895_v31  ;;  %v1390_v32 = vadd.f32 %v2628_v29, %v2663_v26 }
 0x1d9   :  { %v1898_v41 = vpop.f32.mrb[40].mxu1 }
 0x1da   :  { %v1899_v42 = vpop.f32.mrb[41].mxu1 }
 0x1db   :  { %v2632_v43 = vadd.f32 %v1899_v42, %v1898_v41  ;;  %v1901_v44 = vpop.f32.mrb[42].mxu1 }
 0x1dc   :  { %v1902_v45 = vpop.f32.mrb[43].mxu1 }
 0x1dd   :  { %v2634_v46 = vadd.f32 %v1902_v45, %v1901_v44 }
 0x1e1   :  { %v1904_v47 = vpop.f32.mrb[44].mxu1 }
 0x1e2   :  { %v1905_v48 = vpop.f32.mrb[45].mxu1 }
 0x1e3   :  { %v2636_v49 = vadd.f32 %v1905_v48, %v1904_v47  ;;  %v1907_v51 = vpop.f32.mrb[46].mxu1 }
 0x1e4   :  { %v1908_v54 = vpop.f32.mrb[47].mxu1 }
 0x1e5   :  { %v2638_v56 = vadd.f32 %v1908_v54, %v1907_v51 }
 0x1e9   :  { %v1910_v57 = vpop.f32.mrb[48].mxu1 }
 0x1ea   :  { %v1911_v58 = vpop.f32.mrb[49].mxu1 }
 0x1eb   :  { %v2640_v59 = vadd.f32 %v1911_v58, %v1910_v57  ;;  %v1913_v60 = vpop.f32.mrb[50].mxu1 }
 0x1ec   :  { %v1914_v61 = vpop.f32.mrb[51].mxu1 }
 0x1ed   :  { %v2642_v62 = vadd.f32 %v1914_v61, %v1913_v60 }
 0x1f1   :  { %v1916_v63 = vpop.f32.mrb[52].mxu1 }
 0x1f2   :  { %v1917_v1 = vpop.f32.mrb[53].mxu1 }
 0x1f3   :  { %v2644_v2 = vadd.f32 %v1917_v1, %v1916_v63  ;;  %v1919_v3 = vpop.f32.mrb[54].mxu1 }
 0x1f4   :  { %v1920_v4 = vpop.f32.mrb[55].mxu1 }
 0x1f5   :  { %v2646_v5 = vadd.f32 %v1920_v4, %v1919_v3 }
 0x1f9   :  { %v1922_v6 = vpop.f32.mrb[56].mxu1 }
 0x1fa   :  { %v1923_v22 = vpop.f32.mrb[57].mxu1 }
 0x1fb   :  { %v2648_v7 = vadd.f32 %v1923_v22, %v1922_v6  ;;  %v1925_v9 = vpop.f32.mrb[58].mxu1 }
 0x1fc   :  { %v1926_v12 = vpop.f32.mrb[59].mxu1 }
 0x1fd   :  { %v2650_v14 = vadd.f32 %v1926_v12, %v1925_v9 }
 0x201   :  { %v1928_v15 = vpop.f32.mrb[60].mxu1 }
 0x202   :  { %v1929_v23 = vpop.f32.mrb[61].mxu1 }
 0x203   :  { %v2652_v16 = vadd.f32 %v1929_v23, %v1928_v15  ;;  %v1931_v17 = vpop.f32.mrb[62].mxu1 }
 0x204   :  { %v1932_v18 = vpop.f32.mrb[63].mxu1 }
 0x205   :  { %v2657_v20 = vadd.f32 %v1932_v18, %v1931_v17  ;;  %v1393_v17 = vadd.f32 %v2630_v40, %v2663_v26 }
 0x209   :  { %v1268_v28 = vpop.f32.mrb[32].mxu0  ;;  %v1950_v30 = vpop.f32.mrb[64].mxu1 }
 0x20a   :  { %v2106_v33 = vadd.f32 %v1268_v28, %v2660_v24  ;;  %v1270_v36 = vpop.f32.mrb[33].mxu0  ;;  %v1951_v38 = vpop.f32.mrb[65].mxu1 }
 0x20b   :  { %v2107_v11 = vadd.f32 %v1270_v36, %v2666_v27  ;;  %v1952_v53 = vadd.f32 %v1951_v38, %v1950_v30  ;;  %v1272_v55 = vpop.f32.mrb[34].mxu0  ;;  %v1953_v8 = vpop.f32.mrb[66].mxu1 }
 0x20c   :  { %v2108_v10 = vadd.f32 %v1272_v55, %v2660_v24  ;;  %v1274_v50 = vpop.f32.mrb[35].mxu0  ;;  %v1954_v52 = vpop.f32.mrb[67].mxu1  ;;  %v1541_v42 = vmax.f32 %v2106_v33, 0.0 }
 0x20d   :  { %v1479_v31 = vadd.f32 %v1952_v53, %v1382_v37  ;;  %v2109_v39 = vadd.f32 %v1274_v50, %v2666_v27  ;;  %v1955_v41 = vadd.f32 %v1954_v52, %v1953_v8  ;;  %v1542_v45 = vmax.f32 %v2107_v11, 0.0 }
 0x20e   :  { %v1544_v44 = vmax.f32 %v2108_v10, 0.0 }
 0x20f   :  { %v1545_v13 = vmax.f32 %v2109_v39, 0.0  ;;  %v1482_v47 = vadd.f32 %v1955_v41, %v1385_v21  ;;  %v1543_v51 = vmax.f32 %v1479_v31, 0.0  ;;  %v1398_v21 = vadd.f32 %v2632_v43, %v2663_v26 }
 0x210   :  { %v2052_v48 = vpack.c.bf16 %v1544_v44, %v1541_v42 }
 0x211   :  { %v2050_v54 = vpack.c.bf16 %v1545_v13, %v1542_v45  ;;  %v1546_v57 = vmax.f32 %v1482_v47, 0.0  ;;  %v1278_v58 = vpop.f32.mrb[36].mxu0  ;;  %v1956_v60 = vpop.f32.mrb[68].mxu1 }
 0x212   :  { %v2110_v61 = vadd.f32 %v1278_v58, %v2660_v24  ;;  %v1280_v63 = vpop.f32.mrb[37].mxu0  ;;  %v1957_v1 = vpop.f32.mrb[69].mxu1 }
 0x213   :  { %v2083_v3 = vpack.c.bf16 %v1546_v57, %v1543_v51  ;;  %v2111_v4 = vadd.f32 %v1280_v63, %v2666_v27  ;;  %v1958_v6 = vadd.f32 %v1957_v1, %v1956_v60  ;;  %v1282_v22 = vpop.f32.mrb[38].mxu0  ;;  %v1959_v9 = vpop.f32.mrb[70].mxu1  ;;  %2051 = vmatprep.subr.bf16.mxu1 %v2050_v54 }
 0x214   :  { %v2112_v12 = vadd.f32 %v1282_v22, %v2660_v24  ;;  %v1284_v15 = vpop.f32.mrb[39].mxu0  ;;  %v1960_v23 = vpop.f32.mrb[71].mxu1  ;;  %2053 = vmatpush1.bf16.xpose.msra.mxu1 %v2052_v48  ;;  %v1547_v29 = vmax.f32 %v2110_v61, 0.0  ;;  %v1401_v48 = vadd.f32 %v2634_v46, %v2663_v26 }
 0x215   :  { %v1487_v0 = vadd.f32 %v1958_v6, %v1390_v32  ;;  %v2113_v18 = vadd.f32 %v1284_v15, %v2666_v27  ;;  %v1961_v28 = vadd.f32 %v1960_v23, %v1959_v9  ;;  %2084 = vmatpush3.bf16.xpose.msra.mxu0 %v2083_v3  ;;  %v1548_v33 = vmax.f32 %v2111_v4, 0.0 }
 0x216   :  { %v1550_v30 = vmax.f32 %v2112_v12, 0.0  ;;  %2085 = vmatprep.subr.bf16.mxu0 %v2340_v34  ;;  %v1406_v15 = vadd.f32 %v2636_v49, %v2663_v26 }
 0x217   :  { %v1551_v36 = vmax.f32 %v2113_v18, 0.0  ;;  %v1490_v38 = vadd.f32 %v1961_v28, %v1393_v17  ;;  %v1549_v11 = vmax.f32 %v1487_v0, 0.0 }
 0x218   :  { %v2056_v37 = vpack.c.bf16 %v1550_v30, %v1547_v29 }
 0x219   :  { %v2054_v53 = vpack.c.bf16 %v1551_v36, %v1548_v33  ;;  %v1552_v55 = vmax.f32 %v1490_v38, 0.0  ;;  %v1288_v8 = vpop.f32.mrb[40].mxu0  ;;  %v1962_v10 = vpop.f32.mrb[72].mxu1  ;;  %v1409_v36 = vadd.f32 %v2638_v56, %v2663_v26 }
 0x21a   :  { %v2114_v40 = vadd.f32 %v1288_v8, %v2660_v24  ;;  %v1290_v50 = vpop.f32.mrb[41].mxu0  ;;  %v1963_v52 = vpop.f32.mrb[73].mxu1 }
 0x21b   :  { %v2086_v31 = vpack.c.bf16 %v1552_v55, %v1549_v11  ;;  %v2115_v39 = vadd.f32 %v1290_v50, %v2666_v27  ;;  %v1964_v41 = vadd.f32 %v1963_v52, %v1962_v10  ;;  %v1292_v42 = vpop.f32.mrb[42].mxu0  ;;  %v1965_v44 = vpop.f32.mrb[74].mxu1  ;;  %2055 = vmatprep.subr.bf16.mxu1 %v2054_v53 }
 0x21c   :  { %v2116_v45 = vadd.f32 %v1292_v42, %v2660_v24  ;;  %v1294_v13 = vpop.f32.mrb[43].mxu0  ;;  %v1966_v47 = vpop.f32.mrb[75].mxu1  ;;  %2057 = vmatpush1.bf16.xpose.msra.mxu1 %v2056_v37  ;;  %v1553_v43 = vmax.f32 %v2114_v40, 0.0 }
 0x21d   :  { %v1495_v51 = vadd.f32 %v1964_v41, %v1398_v21  ;;  %v2117_v54 = vadd.f32 %v1294_v13, %v2666_v27  ;;  %v1967_v57 = vadd.f32 %v1966_v47, %v1965_v44  ;;  %2087 = vmatpush3.bf16.xpose.msra.mxu0 %v2086_v31  ;;  %v1554_v60 = vmax.f32 %v2115_v39, 0.0 }
 0x21e   :  { %v1556_v58 = vmax.f32 %v2116_v45, 0.0  ;;  %2088 = vmatprep.subr.bf16.mxu0 %v2340_v34  ;;  %v1414_v44 = vadd.f32 %v2640_v59, %v2663_v26 }
 0x21f   :  { %v1557_v61 = vmax.f32 %v2117_v54, 0.0  ;;  %v1498_v63 = vadd.f32 %v1967_v57, %v1401_v48  ;;  %v1555_v32 = vmax.f32 %v1495_v51, 0.0 }
 0x220   :  { %v2060_v1 = vpack.c.bf16 %v1556_v58, %v1553_v43  ;;  %v1417_v58 = vadd.f32 %v2642_v62, %v2663_v26 }
 0x221   :  { %v2058_v3 = vpack.c.bf16 %v1557_v61, %v1554_v60  ;;  %v1558_v4 = vmax.f32 %v1498_v63, 0.0  ;;  %v1298_v6 = vpop.f32.mrb[44].mxu0  ;;  %v1968_v22 = vpop.f32.mrb[76].mxu1 }
 0x222   :  { %v2118_v46 = vadd.f32 %v1298_v6, %v2660_v24  ;;  %v1300_v9 = vpop.f32.mrb[45].mxu0  ;;  %v1969_v12 = vpop.f32.mrb[77].mxu1 }
 0x223   :  { %v2089_v23 = vpack.c.bf16 %v1558_v4, %v1555_v32  ;;  %v2119_v17 = vadd.f32 %v1300_v9, %v2666_v27  ;;  %v1970_v0 = vadd.f32 %v1969_v12, %v1968_v22  ;;  %v1302_v18 = vpop.f32.mrb[46].mxu0  ;;  %v1971_v28 = vpop.f32.mrb[78].mxu1  ;;  %2059 = vmatprep.subr.bf16.mxu1 %v2058_v3 }
 0x224   :  { %v2120_v29 = vadd.f32 %v1302_v18, %v2660_v24  ;;  %v1304_v30 = vpop.f32.mrb[47].mxu0  ;;  %v1972_v33 = vpop.f32.mrb[79].mxu1  ;;  %2061 = vmatpush1.bf16.xpose.msra.mxu1 %v2060_v1  ;;  %v1559_v49 = vmax.f32 %v2118_v46, 0.0 }
 0x225   :  { %v1503_v38 = vadd.f32 %v1970_v0, %v1406_v15  ;;  %v2121_v37 = vadd.f32 %v1304_v30, %v2666_v27  ;;  %v1973_v11 = vadd.f32 %v1972_v33, %v1971_v28  ;;  %2090 = vmatpush3.bf16.xpose.msra.mxu0 %v2089_v23  ;;  %v1560_v55 = vmax.f32 %v2119_v17, 0.0 }
 0x226   :  { %v1562_v53 = vmax.f32 %v2120_v29, 0.0  ;;  %2091 = vmatprep.subr.bf16.mxu0 %v2340_v34  ;;  %v1422_v0 = vadd.f32 %v2644_v2, %v2663_v26 }
 0x227   :  { %v1563_v8 = vmax.f32 %v2121_v37, 0.0  ;;  %v1506_v10 = vadd.f32 %v1973_v11, %v1409_v36  ;;  %v1561_v50 = vmax.f32 %v1503_v38, 0.0  ;;  %v1425_v11 = vadd.f32 %v2646_v5, %v2663_v26 }
 0x228   :  { %v2064_v40 = vpack.c.bf16 %v1562_v53, %v1559_v49 }
 0x229   :  { %v2062_v52 = vpack.c.bf16 %v1563_v8, %v1560_v55  ;;  %v1564_v21 = vmax.f32 %v1506_v10, 0.0  ;;  %v1308_v31 = vpop.f32.mrb[48].mxu0  ;;  %v1974_v39 = vpop.f32.mrb[80].mxu1 }
 0x22a   :  { %v2122_v56 = vadd.f32 %v1308_v31, %v2660_v24  ;;  %v1310_v41 = vpop.f32.mrb[49].mxu0  ;;  %v1975_v42 = vpop.f32.mrb[81].mxu1 }
 0x22b   :  { %v2092_v45 = vpack.c.bf16 %v1564_v21, %v1561_v50  ;;  %v2123_v13 = vadd.f32 %v1310_v41, %v2666_v27  ;;  %v1976_v47 = vadd.f32 %v1975_v42, %v1974_v39  ;;  %v1312_v48 = vpop.f32.mrb[50].mxu0  ;;  %v1977_v51 = vpop.f32.mrb[82].mxu1  ;;  %2063 = vmatprep.subr.bf16.mxu1 %v2062_v52 }
 0x22c   :  { %v2124_v54 = vadd.f32 %v1312_v48, %v2660_v24  ;;  %v1314_v57 = vpop.f32.mrb[51].mxu0  ;;  %v1978_v43 = vpop.f32.mrb[83].mxu1  ;;  %2065 = vmatpush1.bf16.xpose.msra.mxu1 %v2064_v40  ;;  %v1565_v59 = vmax.f32 %v2122_v56, 0.0 }
 0x22d   :  { %v1511_v60 = vadd.f32 %v1976_v47, %v1414_v44  ;;  %v2125_v61 = vadd.f32 %v1314_v57, %v2666_v27  ;;  %v1979_v63 = vadd.f32 %v1978_v43, %v1977_v51  ;;  %2093 = vmatpush3.bf16.xpose.msra.mxu0 %v2092_v45  ;;  %v1566_v32 = vmax.f32 %v2123_v13, 0.0 }
 0x22e   :  { %v1568_v1 = vmax.f32 %v2124_v54, 0.0  ;;  %2094 = vmatprep.subr.bf16.mxu0 %v2340_v34  ;;  %v1430_v45 = vadd.f32 %v2648_v7, %v2663_v26 }
 0x22f   :  { %v1569_v3 = vmax.f32 %v2125_v61, 0.0  ;;  %v1514_v4 = vadd.f32 %v1979_v63, %v1417_v58  ;;  %v1567_v22 = vmax.f32 %v1511_v60, 0.0  ;;  %v1433_v60 = vadd.f32 %v2650_v14, %v2663_v26 }
 0x230   :  { %v2068_v6 = vpack.c.bf16 %v1568_v1, %v1565_v59 }
 0x231   :  { %v2066_v46 = vpack.c.bf16 %v1569_v3, %v1566_v32  ;;  %v1570_v9 = vmax.f32 %v1514_v4, 0.0  ;;  %v1318_v12 = vpop.f32.mrb[52].mxu0  ;;  %v1980_v15 = vpop.f32.mrb[84].mxu1 }
 0x232   :  { %v2126_v62 = vadd.f32 %v1318_v12, %v2660_v24  ;;  %v1320_v23 = vpop.f32.mrb[53].mxu0  ;;  %v1981_v17 = vpop.f32.mrb[85].mxu1 }
 0x233   :  { %v2095_v18 = vpack.c.bf16 %v1570_v9, %v1567_v22  ;;  %v2127_v28 = vadd.f32 %v1320_v23, %v2666_v27  ;;  %v1982_v29 = vadd.f32 %v1981_v17, %v1980_v15  ;;  %v1322_v30 = vpop.f32.mrb[54].mxu0  ;;  %v1983_v33 = vpop.f32.mrb[86].mxu1  ;;  %2067 = vmatprep.subr.bf16.mxu1 %v2066_v46  ;;  %v1438_v17 = vadd.f32 %v2652_v16, %v2663_v26 }
 0x234   :  { %v2128_v36 = vadd.f32 %v1322_v30, %v2660_v24  ;;  %v1324_v38 = vpop.f32.mrb[55].mxu0  ;;  %v1984_v37 = vpop.f32.mrb[87].mxu1  ;;  %2069 = vmatpush1.bf16.xpose.msra.mxu1 %v2068_v6  ;;  %v1571_v2 = vmax.f32 %v2126_v62, 0.0 }
 0x235   :  { %v1519_v49 = vadd.f32 %v1982_v29, %v1422_v0  ;;  %v2129_v53 = vadd.f32 %v1324_v38, %v2666_v27  ;;  %v1985_v55 = vadd.f32 %v1984_v37, %v1983_v33  ;;  %2096 = vmatpush3.bf16.xpose.msra.mxu0 %v2095_v18  ;;  %v1572_v10 = vmax.f32 %v2127_v28, 0.0 }
 0x236   :  { %v1574_v8 = vmax.f32 %v2128_v36, 0.0  ;;  %2097 = vmatprep.subr.bf16.mxu0 %v2340_v34  ;;  %v1441_v37 = vadd.f32 %v2657_v20, %v2663_v26  ;;  %v1594_v20 = vrot.slane %v2624_v35, %v2486_v19  ;;  %v1602_v26 = vrot.slane %v2624_v35, %v2499_v25 }
 0x237   :  { %v1575_v40 = vmax.f32 %v2129_v53, 0.0  ;;  %v1522_v50 = vadd.f32 %v1985_v55, %v1425_v11  ;;  %v1573_v21 = vmax.f32 %v1519_v49, 0.0 }
 0x238   :  { %v2072_v52 = vpack.c.bf16 %v1574_v8, %v1571_v2 }
 0x239   :  { %v2070_v31 = vpack.c.bf16 %v1575_v40, %v1572_v10  ;;  %v1576_v39 = vmax.f32 %v1522_v50, 0.0  ;;  %v1328_v56 = vpop.f32.mrb[56].mxu0  ;;  %v1986_v41 = vpop.f32.mrb[88].mxu1 }
 0x23a   :  { %v2130_v5 = vadd.f32 %v1328_v56, %v2660_v24  ;;  %v1330_v42 = vpop.f32.mrb[57].mxu0  ;;  %v1987_v44 = vpop.f32.mrb[89].mxu1 }
 0x23b   :  { %v2098_v13 = vpack.c.bf16 %v1576_v39, %v1573_v21  ;;  %v2131_v47 = vadd.f32 %v1330_v42, %v2666_v27  ;;  %v1988_v48 = vadd.f32 %v1987_v44, %v1986_v41  ;;  %v1332_v51 = vpop.f32.mrb[58].mxu0  ;;  %v1989_v54 = vpop.f32.mrb[90].mxu1  ;;  %2071 = vmatprep.subr.bf16.mxu1 %v2070_v31 }
 0x23c   :  { %v2132_v57 = vadd.f32 %v1332_v51, %v2660_v24  ;;  %v1334_v43 = vpop.f32.mrb[59].mxu0  ;;  %v1990_v58 = vpop.f32.mrb[91].mxu1  ;;  %2073 = vmatpush1.bf16.xpose.msra.mxu1 %v2072_v52  ;;  %v1577_v7 = vmax.f32 %v2130_v5, 0.0 }
 0x23d   :  { %v1527_v61 = vadd.f32 %v1988_v48, %v1430_v45  ;;  %v2133_v63 = vadd.f32 %v1334_v43, %v2666_v27  ;;  %v1991_v59 = vadd.f32 %v1990_v58, %v1989_v54  ;;  %2099 = vmatpush3.bf16.xpose.msra.mxu0 %v2098_v13  ;;  %v1578_v32 = vmax.f32 %v2131_v47, 0.0 }
 0x23e   :  { %v1580_v1 = vmax.f32 %v2132_v57, 0.0  ;;  %2100 = vmatprep.subr.bf16.mxu0 %v2340_v34 }
 0x23f   :  { %v1581_v3 = vmax.f32 %v2133_v63, 0.0  ;;  %v1530_v4 = vadd.f32 %v1991_v59, %v1433_v60  ;;  %v1579_v22 = vmax.f32 %v1527_v61, 0.0 }
 0x240   :  { %v2076_v6 = vpack.c.bf16 %v1580_v1, %v1577_v7 }
 0x241   :  { %v2074_v46 = vpack.c.bf16 %v1581_v3, %v1578_v32  ;;  %v1582_v9 = vmax.f32 %v1530_v4, 0.0  ;;  %v1338_v12 = vpop.f32.mrb[60].mxu0  ;;  %v1992_v15 = vpop.f32.mrb[92].mxu1 }
 0x242   :  { %v2134_v14 = vadd.f32 %v1338_v12, %v2660_v24  ;;  %v1340_v62 = vpop.f32.mrb[61].mxu0  ;;  %v1993_v23 = vpop.f32.mrb[93].mxu1 }
 0x243   :  { %v2101_v0 = vpack.c.bf16 %v1582_v9, %v1579_v22  ;;  %v2135_v18 = vadd.f32 %v1340_v62, %v2666_v27  ;;  %v1994_v28 = vadd.f32 %v1993_v23, %v1992_v15  ;;  %v1342_v29 = vpop.f32.mrb[62].mxu0  ;;  %v1995_v30 = vpop.f32.mrb[94].mxu1  ;;  %2075 = vmatprep.subr.bf16.mxu1 %v2074_v46 }
 0x244   :  { %v2136_v33 = vadd.f32 %v1342_v29, %v2660_v24  ;;  %v1344_v36 = vpop.f32.mrb[63].mxu0  ;;  %v1996_v38 = vpop.f32.mrb[95].mxu1  ;;  %2077 = vmatpush1.bf16.xpose.msra.mxu1 %v2076_v6  ;;  %v1583_v16 = vmax.f32 %v2134_v14, 0.0 }
 0x245   :  { %v1535_v11 = vadd.f32 %v1994_v28, %v1438_v17  ;;  %v2137_v49 = vadd.f32 %v1344_v36, %v2666_v27  ;;  %v1997_v53 = vadd.f32 %v1996_v38, %v1995_v30  ;;  %2102 = vmatpush3.bf16.xpose.msra.mxu0 %v2101_v0  ;;  %v1584_v2 = vmax.f32 %v2135_v18, 0.0 }
 0x246   :  { %v1586_v55 = vmax.f32 %v2136_v33, 0.0  ;;  %2103 = vmatprep.subr.bf16.mxu0 %v2340_v34 }
 0x247   :  { %v1587_v8 = vmax.f32 %v2137_v49, 0.0  ;;  %v1538_v10 = vadd.f32 %v1997_v53, %v1441_v37  ;;  %v1585_v24 = vmax.f32 %v1535_v11, 0.0 }
 0x248   :  { %v2080_v40 = vpack.c.bf16 %v1586_v55, %v1583_v16 }
 0x249   :  { %v2078_v50 = vpack.c.bf16 %v1587_v8, %v1584_v2  ;;  %v1588_v52 = vmax.f32 %v1538_v10, 0.0 }
 0x24b   :  { %v2104_v21 = vpack.c.bf16 %v1588_v52, %v1585_v24  ;;  %2079 = vmatprep.subr.bf16.mxu1 %v2078_v50 }
 0x24c   :  { %2081 = vmatpush1.bf16.xpose.msra.mxu1 %v2080_v40 }
 0x24d   :  { %2105 = vmatpush3.bf16.xpose.msra.mxu0 %v2104_v21 }
 0x253   :  { %1671 = vmatmul.mubr.f32.vlgmr.msra.gmra.mrb[96].mxu1 %v1594_v20 }
 0x254   :  { %2048 = vmatmul.mubr.f32.vlgmr.msra.gmra.mrb[64].mxu0 %v1602_v26 }
 0x326   :  { %v1672_v34 = vpop.f32.mrb[96].mxu1 }
 0x327   :  { %v1742_v27 = vpop.f32.mrb[64].mxu0  ;;  %v1674_v31 = vpop.f32.mrb[97].mxu1 }
 0x328   :  { %v1743_v39 = vadd.f32 %v1742_v27, %v1672_v34  ;;  %v2049_v56 = vpop.f32.mrb[65].mxu0 }
 0x32a   :  { %1746 = vst [vmem:[%s2751_s6] sm:$0x1] %v1743_v39 }
 0x32b   :  { %1751 = vsyncpa [#allocation3], 1 }

</bundles_post_ra>
